<compile_context>
chip_gen: v6e
topology: v6e:2x2x1
jax: 0.10.0
libtpu: 0.0.40
codegen_flags: <defaults>
</compile_context>

<pallas_src>
import functools

import jax
import jax.numpy as jnp
import numpy as np
from jax.experimental import pallas as pl
from jax.experimental.pallas import tpu as pltpu

# tap order t = (ky)*3 + (kx), offsets (oy, ox) = (ky-1, kx-1)
_TAP_OFFSETS = tuple((oy, ox) for oy in (-1, 0, 1) for ox in (-1, 0, 1))


def _round_up(n, m):
    return ((n + m - 1) // m) * m


# ------------------------------ fused kernel --------------------------------

def _fused_value_model_kernel(*refs, n_feature, n_layers, height, width):
    H, W = height, width
    HW = H * W
    nf = n_feature          # == channel padding of every conv input (asserted host-side)

    it = iter(refs)
    nxt = lambda: next(it)

    masks_ref = nxt()                       # [9, HW]  f32 per-tap zero-pad masks
    state_ref = nxt()                       # [nf, HW] f32 (input channels zero-padded)
    opt_ref = nxt()                         # [nf, HW] f32
    oe_w_ref, oe_b_ref = nxt(), nxt()       # [2nf, 9*nf] bf16, [2nf, 1] f32
    se_refs = [(nxt(), nxt()) for _ in range(n_layers)]   # [nf, 9*nf] bf16, [nf, 1] f32
    vn_w_ref, vn_b_ref = nxt(), nxt()       # [nf, 9*nf] bf16, [nf, 1] f32
    wsel_ref, b0_ref = nxt(), nxt()         # [nf, f0, HW] bf16, [f0, 1] f32
    mid_refs = []
    wl_ref = bl_ref = None
    if n_layers > 1:
        mid_refs = [(nxt(), nxt()) for _ in range(n_layers - 2)]
        wl_ref, bl_ref = nxt(), nxt()       # [f, 1] f32, [1, 1] f32
    out_ref = nxt()                         # [1, 1] f32 (per-sample block)
    xcat_ref = nxt()                        # scratch [9*nf, HW] bf16 (K-stacked taps)

    # per-tap zero-padding masks, loaded once (hoisted), [1, HW] each
    tap_masks = [masks_ref[t:t + 1, :] for t in range(9)]

    def conv3x3_same(x, w_ref, b_ref, *, relu, mask):
        # 'same' 3x3 conv with zero padding.  The 9 lane-rolled (and, if
        # mask=True, zero-pad-masked) taps are K-stacked into one bf16 VMEM
        # scratch and contracted in a SINGLE MXU matmul (K = 9*nf) instead of
        # nine tiny matmuls + eight full-width accumulator adds.
        for t, (oy, ox) in enumerate(_TAP_OFFSETS):
            s = oy * W + ox
            shifted = x if s == 0 else pltpu.roll(x, shift=(-s) % HW, axis=1)
            if mask and s != 0:
                shifted = shifted * tap_masks[t]        # zero-padding mask (f32 VPU)
            xcat_ref[t * nf:(t + 1) * nf, :] = shifted.astype(xcat_ref.dtype)
        acc = jnp.dot(w_ref[...], xcat_ref[...],
                      preferred_element_type=jnp.float32) + b_ref[...]
        return jnp.maximum(acc, 0.0) if relu else acc

    # --- option encoder: Conv(n_opt -> 2*nf, pad=1) + ReLU -------------------
    opt_emb = conv3x3_same(opt_ref[...], oe_w_ref, oe_b_ref, relu=True, mask=True)

    # --- state encoder: n_layers same-convs, ReLU between (not after last) ---
    h = state_ref[...]
    for i, (w_ref, b_ref) in enumerate(se_refs):
        h = conv3x3_same(h, w_ref, b_ref, relu=(i != n_layers - 1), mask=True)

    # --- combine: opt_emb[:nf] * state_emb + opt_emb[nf:] (fused, f32 VPU) ---
    combined = opt_emb[:nf, :] * h + opt_emb[nf:, :]                      # [nf, HW]

    # --- value net: valid conv with fused 2x2 max-pool + ReLU ----------------
    # mask=False is safe ONLY because the wrap-contaminated boundary outputs
    # are never consumed: the maxpool rolls below read rows/cols 1..H-2 only,
    # and wsel (built host-side) selects only interior pooled pixels.
    y = conv3x3_same(combined, vn_w_ref, vn_b_ref, relu=False, mask=False)  # [nf, HW]
    m = jnp.maximum(
        jnp.maximum(y, pltpu.roll(y, shift=HW - 1, axis=1)),
        jnp.maximum(pltpu.roll(y, shift=HW - W, axis=1),
                    pltpu.roll(y, shift=HW - (W + 1), axis=1)))
    r = jnp.maximum(m, 0.0)                                               # [nf, HW]

    # --- first Linear over the CHW-flattened pooled features -----------------
    # Pool-pixel selection + CHW flatten folded into wsel (host side).  Channel
    # groups of 4: fewer sublane broadcasts / XLU lane-reduces than 16 singles
    # while keeping the live product (4*f0*HW f32) inside the vreg budget.
    acc = None
    for c0 in range(0, nf, 4):
        g = min(4, nf - c0)
        w_g = wsel_ref[c0:c0 + g].astype(jnp.float32)       # [g, f0, HW]
        r_g = r[c0:c0 + g][:, None, :]                      # [g, 1,  HW]
        part = jnp.sum(jnp.sum(w_g * r_g, axis=2, keepdims=True), axis=0)  # [f0, 1]
        acc = part if acc is None else acc + part
    hvec = acc + b0_ref[...]                                              # [f0, 1]

    if n_layers == 1:
        out_ref[...] = hvec
        return

    hvec = jnp.maximum(hvec, 0.0)
    for w_ref, b_ref in mid_refs:   # hidden Linears (empty for n_layers == 2)
        hvec = jnp.maximum(
            jnp.dot(w_ref[...], hvec, preferred_element_type=jnp.float32) + b_ref[...],
            0.0)

    # final Linear(f, 1): VPU multiply + full reduce (avoids an M=N=1 matmul).
    out_ref[...] = jnp.sum(hvec * wl_ref[...]) + bl_ref[...]


# --------------------------- host-side preprocessing -------------------------

def make_tap_masks(H, W):
    ys, xs = np.arange(H), np.arange(W)
    rows = []
    for oy, ox in _TAP_OFFSETS:
        my = ((ys + oy) >= 0) & ((ys + oy) < H)
        mx = ((xs + ox) >= 0) & ((xs + ox) < W)
        rows.append((my[:, None] & mx[None, :]).astype(np.float32).reshape(H * W))
    return jnp.asarray(np.stack(rows, axis=0))                # [9, HW] f32


def _conv_kstack(w, b, cin_pad):
    # torch OIHW [Cout, Cin, 3, 3] -> K-stacked [Cout, 9*cin_pad] bf16 matching
    # the in-kernel tap scratch layout (row t*cin_pad + ci = tap t, channel ci).
    cout, cin = int(w.shape[0]), int(w.shape[1])
    wt = jnp.transpose(w, (2, 3, 0, 1)).reshape(9, cout, cin)        # t = ky*3 + kx
    wt = jnp.pad(wt, ((0, 0), (0, 0), (0, cin_pad - cin)))
    w_cat = jnp.transpose(wt, (1, 0, 2)).reshape(cout, 9 * cin_pad)
    return w_cat.astype(jnp.bfloat16), jnp.reshape(b, (cout, 1)).astype(jnp.float32)


def _scatter_linear0(w1, nf, H, W):
    # torch W1 [f0, nf*ph*pw] -> wsel [nf, f0, H*W] bf16 (lane-dense), with the
    # MaxPool pixel selection + CHW flatten folded in; zeros elsewhere.
    # NOTE: only interior pooled pixels (rows/cols 1,3,...,H-3) are selected --
    # this is what makes the unmasked value-net conv in the kernel correct.
    ph, pw = (H - 2) // 2, (W - 2) // 2
    f0 = int(w1.shape[0])
    w1r = jnp.transpose(w1.reshape(f0, nf, ph * pw), (1, 0, 2))      # [c, o, q]
    ys = 1 + 2 * np.arange(ph)                                       # interior rows
    xs = 1 + 2 * np.arange(pw)                                       # interior cols
    pidx = (ys[:, None] * W + xs[None, :]).reshape(-1)               # [ph*pw]
    wsel = jnp.zeros((nf, f0, H * W), jnp.float32)
    return wsel.at[:, :, pidx].set(w1r.astype(jnp.float32)).astype(jnp.bfloat16)


def preprocess_params(raw, n_feature, n_layers, H, W):
    nf = n_feature
    prep = {"masks": make_tap_masks(H, W)}
    prep["oe_w"], prep["oe_b"] = _conv_kstack(*raw["oe"], cin_pad=nf)
    prep["se"] = [_conv_kstack(w, b, cin_pad=nf) for (w, b) in raw["se"]]
    prep["vn_w"], prep["vn_b"] = _conv_kstack(*raw["vn_conv"], cin_pad=nf)
    w0, b0 = raw["vn_lin"][0]
    prep["wsel"] = _scatter_linear0(w0, nf, H, W)
    prep["b0"] = jnp.reshape(b0, (-1, 1)).astype(jnp.float32)
    prep["mid"] = [(w.astype(jnp.float32), jnp.reshape(b, (-1, 1)).astype(jnp.float32))
                   for (w, b) in raw["vn_lin"][1:-1]]
    if n_layers > 1:
        wl, bl = raw["vn_lin"][-1]
        prep["w_last"] = jnp.transpose(wl).astype(jnp.float32)       # [f, 1]
        prep["b_last"] = jnp.reshape(bl, (1, 1)).astype(jnp.float32)
    return prep


# -------------------------------- forward -----------------------------------

def _const_index_map(ndim):
    zeros = (0,) * ndim
    return lambda b: zeros


def value_model_forward(prep, state_bhwc, option_maps, *, n_feature, n_layers):
    """Batched fused forward.

    state_bhwc:  [B, H, W, C]      option_maps: [B, n_opt, H, W]   ->  [B, 1]

    One pallas_call with grid=(B,) marked "parallel" (uses both v7x TCs);
    weights use constant index_maps so they are DMA'd once and stay resident
    in VMEM across the whole batch.
    """
    B, H, W, C = state_bhwc.shape
    n_opt = option_maps.shape[1]
    HW = H * W
    nf = n_feature
    assert nf % 16 == 0 and C <= nf and n_opt <= nf, (
        "kernel packs every conv input to n_feature channels "
        "(bf16 sublane tile = 16); pad n_feature or extend the packing.")

    # Boundary layout plumbing only: channel-major, spatial flattened onto
    # 128-dense lanes; external input channels zero-padded to nf so every conv
    # input is exactly [nf, HW] (matching the K-stacked, zero-padded weights).
    state = jnp.transpose(state_bhwc, (0, 3, 1, 2)).reshape(B, C, HW).astype(jnp.float32)
    state = jnp.pad(state, ((0, 0), (0, nf - C), (0, 0)))
    opts = option_maps.reshape(B, n_opt, HW).astype(jnp.float32)
    opts = jnp.pad(opts, ((0, 0), (0, nf - n_opt), (0, 0)))

    def bcast(arr):     # weight / constant: same block for every grid step
        return pl.BlockSpec(arr.shape, _const_index_map(arr.ndim))

    def per_sample(shape):
        return pl.BlockSpec((None,) + shape, lambda b: (b, 0, 0))

    inputs, in_specs = [], []

    def add(arr, spec):
        inputs.append(arr)
        in_specs.append(spec)

    add(prep["masks"], bcast(prep["masks"]))
    add(state, per_sample((nf, HW)))
    add(opts, per_sample((nf, HW)))
    add(prep["oe_w"], bcast(prep["oe_w"]))
    add(prep["oe_b"], bcast(prep["oe_b"]))
    for w, b in prep["se"]:
        add(w, bcast(w)); add(b, bcast(b))
    add(prep["vn_w"], bcast(prep["vn_w"]))
    add(prep["vn_b"], bcast(prep["vn_b"]))
    add(prep["wsel"], bcast(prep["wsel"]))
    add(prep["b0"], bcast(prep["b0"]))
    if n_layers > 1:
        for w, b in prep["mid"]:
            add(w, bcast(w)); add(b, bcast(b))
        add(prep["w_last"], bcast(prep["w_last"]))
        add(prep["b_last"], bcast(prep["b_last"]))

    kernel = functools.partial(
        _fused_value_model_kernel,
        n_feature=nf, n_layers=n_layers, height=H, width=W)

    out = pl.pallas_call(
        kernel,
        out_shape=jax.ShapeDtypeStruct((B, 1, 1), jnp.float32),
        grid_spec=pltpu.PrefetchScalarGridSpec(
            num_scalar_prefetch=0,
            grid=(B,),
            in_specs=in_specs,
            out_specs=pl.BlockSpec((None, 1, 1), lambda b: (b, 0, 0)),
            scratch_shapes=[pltpu.VMEM((9 * nf, HW), jnp.bfloat16)]),
        compiler_params=pltpu.CompilerParams(dimension_semantics=("parallel",)),
    )(*inputs)
    return out.reshape(B, 1)


# ------------------------------ parameter init ------------------------------

def init_params(key, channels, n_feature, n_layers, n_options, imx, imy):
    nf = n_feature

    def conv_init(k, cin, cout):
        k1, k2 = jax.random.split(k)
        w = jax.random.normal(k1, (cout, cin, 3, 3), jnp.float32) * 0.1   # torch OIHW
        b = jax.random.normal(k2, (cout,), jnp.float32) * 0.1
        return w, b

    def linear_init(k, fin, fout):
        k1, k2 = jax.random.split(k)
        w = jax.random.normal(k1, (fout, fin), jnp.float32) * 0.05        # torch [out, in]
        b = jax.random.normal(k2, (fout,), jnp.float32) * 0.05
        return w, b

    keys = list(jax.random.split(key, 2 + 2 * n_layers))
    raw = {"oe": conv_init(keys.pop(), n_options, 2 * nf)}
    se, cin = [], channels
    for _ in range(n_layers):
        se.append(conv_init(keys.pop(), cin, nf))
        cin = nf
    raw["se"] = se
    raw["vn_conv"] = conv_init(keys.pop(), nf, nf)
    ph, pw = (imx - 2) // 2, (imy - 2) // 2
    fin = nf * ph * pw
    lins = []
    for i in range(n_layers):
        fout = nf if i != n_layers - 1 else 1
        lins.append(linear_init(keys.pop(), fin, fout))
        fin = fout
    raw["vn_lin"] = lins
    return raw


# --------------------------- numpy reference (f64) ---------------------------

def _np_reference(raw, state_hwc, option_maps, n_feature, n_layers):
    nf = n_feature
    relu = lambda a: np.maximum(a, 0.0)

    def conv2d(x, w, b, pad):
        w = np.asarray(w, np.float64)
        b = np.asarray(b, np.float64)
        cout = w.shape[0]
        if pad:
            xp = np.pad(x, ((0, 0), (1, 1), (1, 1)))
            ho, wo = x.shape[1], x.shape[2]
        else:
            xp = x
            ho, wo = x.shape[1] - 2, x.shape[2] - 2
        out = np.zeros((cout, ho, wo), np.float64)
        for ky in range(3):
            for kx in range(3):
                out += np.einsum("oc,chw->ohw", w[:, :, ky, kx],
                                 xp[:, ky:ky + ho, kx:kx + wo])
        return out + b[:, None, None]

    oe = relu(conv2d(np.asarray(option_maps, np.float64), *raw["oe"], pad=True))
    h = np.transpose(np.asarray(state_hwc, np.float64), (2, 0, 1))
    for i, (w, b) in enumerate(raw["se"]):
        h = conv2d(h, w, b, pad=True)
        if i != n_layers - 1:
            h = relu(h)
    comb = oe[:nf] * h + oe[nf:]
    y = conv2d(comb, *raw["vn_conv"], pad=False)
    ho, wo = y.shape[1] // 2, y.shape[2] // 2
    pooled = relu(y[:, :2 * ho, :2 * wo].reshape(-1, ho, 2, wo, 2).max(axis=(2, 4)))
    flat = pooled.reshape(1, -1)
    for i, (w, b) in enumerate(raw["vn_lin"]):
        flat = flat @ np.asarray(w, np.float64).T + np.asarray(b, np.float64)
        if i != n_layers - 1:
            flat = relu(flat)
    return flat


# --------------------------------- main --------------------------------------

if __name__ == "__main__":
    key = jax.random.PRNGKey(0)
    batch, channels, imx, imy = 2, 3, 16, 16          # image_shape = [1, 3, 16, 16]
    n_feature, n_layers, n_options = 16, 2, 3

    k_params, k_state = jax.random.split(key)
    raw = init_params(k_params, channels, n_feature, n_layers, n_options, imx, imy)
    prep = preprocess_params(raw, n_feature, n_layers, imx, imy)

    # batched states arrive HWC (the torch code permutes (2,0,1)); built HWC.
    state_bhwc = jax.random.uniform(k_state, (batch, imx, imy, channels), jnp.float32)

    # options encoded as one-hot pixel + depth added everywhere (EncoderModel.encode).
    # TODO(synk): host-side Option-object handling / torch.from_numpy glue stays in Python.
    option_maps = []
    for b in range(batch):
        per_b = []
        for i in range(n_options):
            m = jnp.zeros((imx, imy), jnp.float32)
            m = m.at[(2 * i + 1 + b) % imx, (3 * i + 2 + 2 * b) % imy].set(1.0)
            m = m + jnp.float32(i)  # depth
            per_b.append(m)
        option_maps.append(jnp.stack(per_b, axis=0))
    option_maps = jnp.stack(option_maps, axis=0)      # [B, n_options, imx, imy]

    fwd = jax.jit(functools.partial(value_model_forward,
                                    n_feature=n_feature, n_layers=n_layers))
    out = jax.block_until_ready(fwd(prep, state_bhwc, option_maps))

    ref = np.concatenate(
        [_np_reference(raw, np.asarray(state_bhwc[b]), np.asarray(option_maps[b]),
                       n_feature, n_layers) for b in range(batch)], axis=0)
    assert out.shape == (batch, 1) and bool(jnp.isfinite(out).all())
    # bf16 MXU operands (K-stacked taps, weights, wsel) loosen numerics slightly
    # vs the f64 reference; f32 accumulation keeps the error ~1e-2 on O(1) outputs.
    assert np.allclose(np.asarray(out), ref, rtol=5e-2, atol=5e-2), (np.asarray(out), ref)
    print("KERNEL_OK")
</pallas_src>

<mosaic_0001>
module attributes {stable_mosaic.version = 11 : i64} {
  func.func @_fused_value_model_kernel(%arg0: i32, %arg1: memref<9x256xf32, #tpu.memory_space<vmem>>, %arg2: memref<1x16x256xf32, #tpu.memory_space<vmem>>, %arg3: memref<1x16x256xf32, #tpu.memory_space<vmem>>, %arg4: memref<32x144xbf16, #tpu.memory_space<vmem>>, %arg5: memref<32x1xf32, #tpu.memory_space<vmem>>, %arg6: memref<16x144xbf16, #tpu.memory_space<vmem>>, %arg7: memref<16x1xf32, #tpu.memory_space<vmem>>, %arg8: memref<16x144xbf16, #tpu.memory_space<vmem>>, %arg9: memref<16x1xf32, #tpu.memory_space<vmem>>, %arg10: memref<16x144xbf16, #tpu.memory_space<vmem>>, %arg11: memref<16x1xf32, #tpu.memory_space<vmem>>, %arg12: memref<16x16x256xbf16, #tpu.memory_space<vmem>>, %arg13: memref<16x1xf32, #tpu.memory_space<vmem>>, %arg14: memref<16x1xf32, #tpu.memory_space<vmem>>, %arg15: memref<1x1xf32, #tpu.memory_space<vmem>>, %arg16: memref<1x1x1xf32, #tpu.memory_space<vmem>>, %arg17: memref<144x256xbf16, #tpu.memory_space<vmem>>) attributes {dimension_semantics = [#tpu.dimension_semantics<parallel>], iteration_bounds = array<i64: 2>, scalar_prefetch = 0 : i64, scratch_operands = 1 : i64, tpu.core_type = #tpu.core_type<tc>, window_params = [{pipeline_mode = #tpu.pipeline_mode<synchronous>, transform_indices = @transform_0, window_bounds = array<i64: 9, 256>}, {transform_indices = @transform_1, window_bounds = array<i64: 1, 16, 256>}, {transform_indices = @transform_2, window_bounds = array<i64: 1, 16, 256>}, {pipeline_mode = #tpu.pipeline_mode<synchronous>, transform_indices = @transform_3, window_bounds = array<i64: 32, 144>}, {pipeline_mode = #tpu.pipeline_mode<synchronous>, transform_indices = @transform_4, window_bounds = array<i64: 32, 1>}, {pipeline_mode = #tpu.pipeline_mode<synchronous>, transform_indices = @transform_5, window_bounds = array<i64: 16, 144>}, {pipeline_mode = #tpu.pipeline_mode<synchronous>, transform_indices = @transform_6, window_bounds = array<i64: 16, 1>}, {pipeline_mode = #tpu.pipeline_mode<synchronous>, transform_indices = @transform_7, window_bounds = array<i64: 16, 144>}, {pipeline_mode = #tpu.pipeline_mode<synchronous>, transform_indices = @transform_8, window_bounds = array<i64: 16, 1>}, {pipeline_mode = #tpu.pipeline_mode<synchronous>, transform_indices = @transform_9, window_bounds = array<i64: 16, 144>}, {pipeline_mode = #tpu.pipeline_mode<synchronous>, transform_indices = @transform_10, window_bounds = array<i64: 16, 1>}, {pipeline_mode = #tpu.pipeline_mode<synchronous>, transform_indices = @transform_11, window_bounds = array<i64: 16, 16, 256>}, {pipeline_mode = #tpu.pipeline_mode<synchronous>, transform_indices = @transform_12, window_bounds = array<i64: 16, 1>}, {pipeline_mode = #tpu.pipeline_mode<synchronous>, transform_indices = @transform_13, window_bounds = array<i64: 16, 1>}, {pipeline_mode = #tpu.pipeline_mode<synchronous>, transform_indices = @transform_14, window_bounds = array<i64: 1, 1>}, {transform_indices = @transform_15, window_bounds = array<i64: 1, 1, 1>}]} {
    %c0 = arith.constant 0 : index
    %c0_0 = arith.constant 0 : index
    %0 = vector.load %arg1[%c0, %c0_0] : memref<9x256xf32, #tpu.memory_space<vmem>>, vector<1x256xf32>
    %c1 = arith.constant 1 : index
    %c0_1 = arith.constant 0 : index
    %1 = vector.load %arg1[%c1, %c0_1] : memref<9x256xf32, #tpu.memory_space<vmem>>, vector<1x256xf32>
    %c2 = arith.constant 2 : index
    %c0_2 = arith.constant 0 : index
    %2 = vector.load %arg1[%c2, %c0_2] : memref<9x256xf32, #tpu.memory_space<vmem>>, vector<1x256xf32>
    %c3 = arith.constant 3 : index
    %c0_3 = arith.constant 0 : index
    %3 = vector.load %arg1[%c3, %c0_3] : memref<9x256xf32, #tpu.memory_space<vmem>>, vector<1x256xf32>
    %c5 = arith.constant 5 : index
    %c0_4 = arith.constant 0 : index
    %4 = vector.load %arg1[%c5, %c0_4] : memref<9x256xf32, #tpu.memory_space<vmem>>, vector<1x256xf32>
    %c6 = arith.constant 6 : index
    %c0_5 = arith.constant 0 : index
    %5 = vector.load %arg1[%c6, %c0_5] : memref<9x256xf32, #tpu.memory_space<vmem>>, vector<1x256xf32>
    %c7 = arith.constant 7 : index
    %c0_6 = arith.constant 0 : index
    %6 = vector.load %arg1[%c7, %c0_6] : memref<9x256xf32, #tpu.memory_space<vmem>>, vector<1x256xf32>
    %c8 = arith.constant 8 : index
    %c0_7 = arith.constant 0 : index
    %7 = vector.load %arg1[%c8, %c0_7] : memref<9x256xf32, #tpu.memory_space<vmem>>, vector<1x256xf32>
    %c0_8 = arith.constant 0 : index
    %c0_9 = arith.constant 0 : index
    %c0_10 = arith.constant 0 : index
    %8 = vector.load %arg3[%c0_8, %c0_9, %c0_10] : memref<1x16x256xf32, #tpu.memory_space<vmem>>, vector<1x16x256xf32>
    %9 = vector.shape_cast %8 : vector<1x16x256xf32> to vector<16x256xf32>
    %c17_i32 = arith.constant 17 : i32
    %10 = tpu.dynamic_rotate %9 by %c17_i32 dim 1 : vector<16x256xf32>, i32 -> vector<16x256xf32>
    %11 = vector.broadcast %0 : vector<1x256xf32> to vector<16x256xf32>
    %12 = arith.mulf %10, %11 : vector<16x256xf32>
    %13 = arith.truncf %12 : vector<16x256xf32> to vector<16x256xbf16>
    %c0_11 = arith.constant 0 : index
    %c0_12 = arith.constant 0 : index
    %14 = vector.load %arg17[%c0_11, %c0_12] : memref<144x256xbf16, #tpu.memory_space<vmem>>, vector<16x256xbf16>
    tpu.vector_store %arg17[%c0_11, %c0_12], %13 {strides = array<i32>} : memref<144x256xbf16, #tpu.memory_space<vmem>>, vector<16x256xbf16>,
    %c16_i32 = arith.constant 16 : i32
    %15 = tpu.dynamic_rotate %9 by %c16_i32 dim 1 : vector<16x256xf32>, i32 -> vector<16x256xf32>
    %16 = vector.broadcast %1 : vector<1x256xf32> to vector<16x256xf32>
    %17 = arith.mulf %15, %16 : vector<16x256xf32>
    %18 = arith.truncf %17 : vector<16x256xf32> to vector<16x256xbf16>
    %c16 = arith.constant 16 : index
    %c0_13 = arith.constant 0 : index
    %19 = vector.load %arg17[%c16, %c0_13] : memref<144x256xbf16, #tpu.memory_space<vmem>>, vector<16x256xbf16>
    tpu.vector_store %arg17[%c16, %c0_13], %18 {strides = array<i32>} : memref<144x256xbf16, #tpu.memory_space<vmem>>, vector<16x256xbf16>,
    %c15_i32 = arith.constant 15 : i32
    %20 = tpu.dynamic_rotate %9 by %c15_i32 dim 1 : vector<16x256xf32>, i32 -> vector<16x256xf32>
    %21 = vector.broadcast %2 : vector<1x256xf32> to vector<16x256xf32>
    %22 = arith.mulf %20, %21 : vector<16x256xf32>
    %23 = arith.truncf %22 : vector<16x256xf32> to vector<16x256xbf16>
    %c32 = arith.constant 32 : index
    %c0_14 = arith.constant 0 : index
    %24 = vector.load %arg17[%c32, %c0_14] : memref<144x256xbf16, #tpu.memory_space<vmem>>, vector<16x256xbf16>
    tpu.vector_store %arg17[%c32, %c0_14], %23 {strides = array<i32>} : memref<144x256xbf16, #tpu.memory_space<vmem>>, vector<16x256xbf16>,
    %c1_i32 = arith.constant 1 : i32
    %25 = tpu.dynamic_rotate %9 by %c1_i32 dim 1 : vector<16x256xf32>, i32 -> vector<16x256xf32>
    %26 = vector.broadcast %3 : vector<1x256xf32> to vector<16x256xf32>
    %27 = arith.mulf %25, %26 : vector<16x256xf32>
    %28 = arith.truncf %27 : vector<16x256xf32> to vector<16x256xbf16>
    %c48 = arith.constant 48 : index
    %c0_15 = arith.constant 0 : index
    %29 = vector.load %arg17[%c48, %c0_15] : memref<144x256xbf16, #tpu.memory_space<vmem>>, vector<16x256xbf16>
    tpu.vector_store %arg17[%c48, %c0_15], %28 {strides = array<i32>} : memref<144x256xbf16, #tpu.memory_space<vmem>>, vector<16x256xbf16>,
    %30 = arith.truncf %9 : vector<16x256xf32> to vector<16x256xbf16>
    %c64 = arith.constant 64 : index
    %c0_16 = arith.constant 0 : index
    %31 = vector.load %arg17[%c64, %c0_16] : memref<144x256xbf16, #tpu.memory_space<vmem>>, vector<16x256xbf16>
    tpu.vector_store %arg17[%c64, %c0_16], %30 {strides = array<i32>} : memref<144x256xbf16, #tpu.memory_space<vmem>>, vector<16x256xbf16>,
    %c255_i32 = arith.constant 255 : i32
    %32 = tpu.dynamic_rotate %9 by %c255_i32 dim 1 : vector<16x256xf32>, i32 -> vector<16x256xf32>
    %33 = vector.broadcast %4 : vector<1x256xf32> to vector<16x256xf32>
    %34 = arith.mulf %32, %33 : vector<16x256xf32>
    %35 = arith.truncf %34 : vector<16x256xf32> to vector<16x256xbf16>
    %c80 = arith.constant 80 : index
    %c0_17 = arith.constant 0 : index
    %36 = vector.load %arg17[%c80, %c0_17] : memref<144x256xbf16, #tpu.memory_space<vmem>>, vector<16x256xbf16>
    tpu.vector_store %arg17[%c80, %c0_17], %35 {strides = array<i32>} : memref<144x256xbf16, #tpu.memory_space<vmem>>, vector<16x256xbf16>,
    %c241_i32 = arith.constant 241 : i32
    %37 = tpu.dynamic_rotate %9 by %c241_i32 dim 1 : vector<16x256xf32>, i32 -> vector<16x256xf32>
    %38 = vector.broadcast %5 : vector<1x256xf32> to vector<16x256xf32>
    %39 = arith.mulf %37, %38 : vector<16x256xf32>
    %40 = arith.truncf %39 : vector<16x256xf32> to vector<16x256xbf16>
    %c96 = arith.constant 96 : index
    %c0_18 = arith.constant 0 : index
    %41 = vector.load %arg17[%c96, %c0_18] : memref<144x256xbf16, #tpu.memory_space<vmem>>, vector<16x256xbf16>
    tpu.vector_store %arg17[%c96, %c0_18], %40 {strides = array<i32>} : memref<144x256xbf16, #tpu.memory_space<vmem>>, vector<16x256xbf16>,
    %c240_i32 = arith.constant 240 : i32
    %42 = tpu.dynamic_rotate %9 by %c240_i32 dim 1 : vector<16x256xf32>, i32 -> vector<16x256xf32>
    %43 = vector.broadcast %6 : vector<1x256xf32> to vector<16x256xf32>
    %44 = arith.mulf %42, %43 : vector<16x256xf32>
    %45 = arith.truncf %44 : vector<16x256xf32> to vector<16x256xbf16>
    %c112 = arith.constant 112 : index
    %c0_19 = arith.constant 0 : index
    %46 = vector.load %arg17[%c112, %c0_19] : memref<144x256xbf16, #tpu.memory_space<vmem>>, vector<16x256xbf16>
    tpu.vector_store %arg17[%c112, %c0_19], %45 {strides = array<i32>} : memref<144x256xbf16, #tpu.memory_space<vmem>>, vector<16x256xbf16>,
    %c239_i32 = arith.constant 239 : i32
    %47 = tpu.dynamic_rotate %9 by %c239_i32 dim 1 : vector<16x256xf32>, i32 -> vector<16x256xf32>
    %48 = vector.broadcast %7 : vector<1x256xf32> to vector<16x256xf32>
    %49 = arith.mulf %47, %48 : vector<16x256xf32>
    %50 = arith.truncf %49 : vector<16x256xf32> to vector<16x256xbf16>
    %c128 = arith.constant 128 : index
    %c0_20 = arith.constant 0 : index
    %51 = vector.load %arg17[%c128, %c0_20] : memref<144x256xbf16, #tpu.memory_space<vmem>>, vector<16x256xbf16>
    tpu.vector_store %arg17[%c128, %c0_20], %50 {strides = array<i32>} : memref<144x256xbf16, #tpu.memory_space<vmem>>, vector<16x256xbf16>,
    %c0_21 = arith.constant 0 : index
    %c0_22 = arith.constant 0 : index
    %52 = vector.load %arg4[%c0_21, %c0_22] : memref<32x144xbf16, #tpu.memory_space<vmem>>, vector<32x144xbf16>
    %c0_23 = arith.constant 0 : index
    %c0_24 = arith.constant 0 : index
    %53 = vector.load %arg17[%c0_23, %c0_24] : memref<144x256xbf16, #tpu.memory_space<vmem>>, vector<144x256xbf16>
    %cst = arith.constant dense<0.000000e+00> : vector<32x256xf32>
    %54 = tpu.matmul %52, %53, %cst {dimension_numbers = #tpu.dot_dimension_numbers<[1], [0], [0], [1], [0, 0, 1, 1], [], []>} : vector<32x144xbf16>, vector<144x256xbf16>, vector<32x256xf32> -> vector<32x256xf32>
    %c0_25 = arith.constant 0 : index
    %c0_26 = arith.constant 0 : index
    %55 = vector.load %arg5[%c0_25, %c0_26] : memref<32x1xf32, #tpu.memory_space<vmem>>, vector<32x1xf32>
    %56 = vector.broadcast %55 : vector<32x1xf32> to vector<32x256xf32>
    %57 = arith.addf %54, %56 : vector<32x256xf32>
    %cst_27 = arith.constant 0.000000e+00 : f32
    %58 = vector.broadcast %cst_27 : f32 to vector<32x256xf32>
    %59 = arith.maximumf %57, %58 : vector<32x256xf32>
    %c0_28 = arith.constant 0 : index
    %c0_29 = arith.constant 0 : index
    %c0_30 = arith.constant 0 : index
    %60 = vector.load %arg2[%c0_28, %c0_29, %c0_30] : memref<1x16x256xf32, #tpu.memory_space<vmem>>, vector<1x16x256xf32>
    %61 = vector.shape_cast %60 : vector<1x16x256xf32> to vector<16x256xf32>
    %c17_i32_31 = arith.constant 17 : i32
    %62 = tpu.dynamic_rotate %61 by %c17_i32_31 dim 1 : vector<16x256xf32>, i32 -> vector<16x256xf32>
    %63 = vector.broadcast %0 : vector<1x256xf32> to vector<16x256xf32>
    %64 = arith.mulf %62, %63 : vector<16x256xf32>
    %65 = arith.truncf %64 : vector<16x256xf32> to vector<16x256xbf16>
    %c0_32 = arith.constant 0 : index
    %c0_33 = arith.constant 0 : index
    %66 = vector.load %arg17[%c0_32, %c0_33] : memref<144x256xbf16, #tpu.memory_space<vmem>>, vector<16x256xbf16>
    tpu.vector_store %arg17[%c0_32, %c0_33], %65 {strides = array<i32>} : memref<144x256xbf16, #tpu.memory_space<vmem>>, vector<16x256xbf16>,
    %c16_i32_34 = arith.constant 16 : i32
    %67 = tpu.dynamic_rotate %61 by %c16_i32_34 dim 1 : vector<16x256xf32>, i32 -> vector<16x256xf32>
    %68 = vector.broadcast %1 : vector<1x256xf32> to vector<16x256xf32>
    %69 = arith.mulf %67, %68 : vector<16x256xf32>
    %70 = arith.truncf %69 : vector<16x256xf32> to vector<16x256xbf16>
    %c16_35 = arith.constant 16 : index
    %c0_36 = arith.constant 0 : index
    %71 = vector.load %arg17[%c16_35, %c0_36] : memref<144x256xbf16, #tpu.memory_space<vmem>>, vector<16x256xbf16>
    tpu.vector_store %arg17[%c16_35, %c0_36], %70 {strides = array<i32>} : memref<144x256xbf16, #tpu.memory_space<vmem>>, vector<16x256xbf16>,
    %c15_i32_37 = arith.constant 15 : i32
    %72 = tpu.dynamic_rotate %61 by %c15_i32_37 dim 1 : vector<16x256xf32>, i32 -> vector<16x256xf32>
    %73 = vector.broadcast %2 : vector<1x256xf32> to vector<16x256xf32>
    %74 = arith.mulf %72, %73 : vector<16x256xf32>
    %75 = arith.truncf %74 : vector<16x256xf32> to vector<16x256xbf16>
    %c32_38 = arith.constant 32 : index
    %c0_39 = arith.constant 0 : index
    %76 = vector.load %arg17[%c32_38, %c0_39] : memref<144x256xbf16, #tpu.memory_space<vmem>>, vector<16x256xbf16>
    tpu.vector_store %arg17[%c32_38, %c0_39], %75 {strides = array<i32>} : memref<144x256xbf16, #tpu.memory_space<vmem>>, vector<16x256xbf16>,
    %c1_i32_40 = arith.constant 1 : i32
    %77 = tpu.dynamic_rotate %61 by %c1_i32_40 dim 1 : vector<16x256xf32>, i32 -> vector<16x256xf32>
    %78 = vector.broadcast %3 : vector<1x256xf32> to vector<16x256xf32>
    %79 = arith.mulf %77, %78 : vector<16x256xf32>
    %80 = arith.truncf %79 : vector<16x256xf32> to vector<16x256xbf16>
    %c48_41 = arith.constant 48 : index
    %c0_42 = arith.constant 0 : index
    %81 = vector.load %arg17[%c48_41, %c0_42] : memref<144x256xbf16, #tpu.memory_space<vmem>>, vector<16x256xbf16>
    tpu.vector_store %arg17[%c48_41, %c0_42], %80 {strides = array<i32>} : memref<144x256xbf16, #tpu.memory_space<vmem>>, vector<16x256xbf16>,
    %82 = arith.truncf %61 : vector<16x256xf32> to vector<16x256xbf16>
    %c64_43 = arith.constant 64 : index
    %c0_44 = arith.constant 0 : index
    %83 = vector.load %arg17[%c64_43, %c0_44] : memref<144x256xbf16, #tpu.memory_space<vmem>>, vector<16x256xbf16>
    tpu.vector_store %arg17[%c64_43, %c0_44], %82 {strides = array<i32>} : memref<144x256xbf16, #tpu.memory_space<vmem>>, vector<16x256xbf16>,
    %c255_i32_45 = arith.constant 255 : i32
    %84 = tpu.dynamic_rotate %61 by %c255_i32_45 dim 1 : vector<16x256xf32>, i32 -> vector<16x256xf32>
    %85 = vector.broadcast %4 : vector<1x256xf32> to vector<16x256xf32>
    %86 = arith.mulf %84, %85 : vector<16x256xf32>
    %87 = arith.truncf %86 : vector<16x256xf32> to vector<16x256xbf16>
    %c80_46 = arith.constant 80 : index
    %c0_47 = arith.constant 0 : index
    %88 = vector.load %arg17[%c80_46, %c0_47] : memref<144x256xbf16, #tpu.memory_space<vmem>>, vector<16x256xbf16>
    tpu.vector_store %arg17[%c80_46, %c0_47], %87 {strides = array<i32>} : memref<144x256xbf16, #tpu.memory_space<vmem>>, vector<16x256xbf16>,
    %c241_i32_48 = arith.constant 241 : i32
    %89 = tpu.dynamic_rotate %61 by %c241_i32_48 dim 1 : vector<16x256xf32>, i32 -> vector<16x256xf32>
    %90 = vector.broadcast %5 : vector<1x256xf32> to vector<16x256xf32>
    %91 = arith.mulf %89, %90 : vector<16x256xf32>
    %92 = arith.truncf %91 : vector<16x256xf32> to vector<16x256xbf16>
    %c96_49 = arith.constant 96 : index
    %c0_50 = arith.constant 0 : index
    %93 = vector.load %arg17[%c96_49, %c0_50] : memref<144x256xbf16, #tpu.memory_space<vmem>>, vector<16x256xbf16>
    tpu.vector_store %arg17[%c96_49, %c0_50], %92 {strides = array<i32>} : memref<144x256xbf16, #tpu.memory_space<vmem>>, vector<16x256xbf16>,
    %c240_i32_51 = arith.constant 240 : i32
    %94 = tpu.dynamic_rotate %61 by %c240_i32_51 dim 1 : vector<16x256xf32>, i32 -> vector<16x256xf32>
    %95 = vector.broadcast %6 : vector<1x256xf32> to vector<16x256xf32>
    %96 = arith.mulf %94, %95 : vector<16x256xf32>
    %97 = arith.truncf %96 : vector<16x256xf32> to vector<16x256xbf16>
    %c112_52 = arith.constant 112 : index
    %c0_53 = arith.constant 0 : index
    %98 = vector.load %arg17[%c112_52, %c0_53] : memref<144x256xbf16, #tpu.memory_space<vmem>>, vector<16x256xbf16>
    tpu.vector_store %arg17[%c112_52, %c0_53], %97 {strides = array<i32>} : memref<144x256xbf16, #tpu.memory_space<vmem>>, vector<16x256xbf16>,
    %c239_i32_54 = arith.constant 239 : i32
    %99 = tpu.dynamic_rotate %61 by %c239_i32_54 dim 1 : vector<16x256xf32>, i32 -> vector<16x256xf32>
    %100 = vector.broadcast %7 : vector<1x256xf32> to vector<16x256xf32>
    %101 = arith.mulf %99, %100 : vector<16x256xf32>
    %102 = arith.truncf %101 : vector<16x256xf32> to vector<16x256xbf16>
    %c128_55 = arith.constant 128 : index
    %c0_56 = arith.constant 0 : index
    %103 = vector.load %arg17[%c128_55, %c0_56] : memref<144x256xbf16, #tpu.memory_space<vmem>>, vector<16x256xbf16>
    tpu.vector_store %arg17[%c128_55, %c0_56], %102 {strides = array<i32>} : memref<144x256xbf16, #tpu.memory_space<vmem>>, vector<16x256xbf16>,
    %c0_57 = arith.constant 0 : index
    %c0_58 = arith.constant 0 : index
    %104 = vector.load %arg6[%c0_57, %c0_58] : memref<16x144xbf16, #tpu.memory_space<vmem>>, vector<16x144xbf16>
    %c0_59 = arith.constant 0 : index
    %c0_60 = arith.constant 0 : index
    %105 = vector.load %arg17[%c0_59, %c0_60] : memref<144x256xbf16, #tpu.memory_space<vmem>>, vector<144x256xbf16>
    %cst_61 = arith.constant dense<0.000000e+00> : vector<16x256xf32>
    %106 = tpu.matmul %104, %105, %cst_61 {dimension_numbers = #tpu.dot_dimension_numbers<[1], [0], [0], [1], [0, 0, 1, 1], [], []>} : vector<16x144xbf16>, vector<144x256xbf16>, vector<16x256xf32> -> vector<16x256xf32>
    %c0_62 = arith.constant 0 : index
    %c0_63 = arith.constant 0 : index
    %107 = vector.load %arg7[%c0_62, %c0_63] : memref<16x1xf32, #tpu.memory_space<vmem>>, vector<16x1xf32>
    %108 = vector.broadcast %107 : vector<16x1xf32> to vector<16x256xf32>
    %109 = arith.addf %106, %108 : vector<16x256xf32>
    %cst_64 = arith.constant 0.000000e+00 : f32
    %110 = vector.broadcast %cst_64 : f32 to vector<16x256xf32>
    %111 = arith.maximumf %109, %110 : vector<16x256xf32>
    %c17_i32_65 = arith.constant 17 : i32
    %112 = tpu.dynamic_rotate %111 by %c17_i32_65 dim 1 : vector<16x256xf32>, i32 -> vector<16x256xf32>
    %113 = vector.broadcast %0 : vector<1x256xf32> to vector<16x256xf32>
    %114 = arith.mulf %112, %113 : vector<16x256xf32>
    %115 = arith.truncf %114 : vector<16x256xf32> to vector<16x256xbf16>
    %c0_66 = arith.constant 0 : index
    %c0_67 = arith.constant 0 : index
    %116 = vector.load %arg17[%c0_66, %c0_67] : memref<144x256xbf16, #tpu.memory_space<vmem>>, vector<16x256xbf16>
    tpu.vector_store %arg17[%c0_66, %c0_67], %115 {strides = array<i32>} : memref<144x256xbf16, #tpu.memory_space<vmem>>, vector<16x256xbf16>,
    %c16_i32_68 = arith.constant 16 : i32
    %117 = tpu.dynamic_rotate %111 by %c16_i32_68 dim 1 : vector<16x256xf32>, i32 -> vector<16x256xf32>
    %118 = vector.broadcast %1 : vector<1x256xf32> to vector<16x256xf32>
    %119 = arith.mulf %117, %118 : vector<16x256xf32>
    %120 = arith.truncf %119 : vector<16x256xf32> to vector<16x256xbf16>
    %c16_69 = arith.constant 16 : index
    %c0_70 = arith.constant 0 : index
    %121 = vector.load %arg17[%c16_69, %c0_70] : memref<144x256xbf16, #tpu.memory_space<vmem>>, vector<16x256xbf16>
    tpu.vector_store %arg17[%c16_69, %c0_70], %120 {strides = array<i32>} : memref<144x256xbf16, #tpu.memory_space<vmem>>, vector<16x256xbf16>,
    %c15_i32_71 = arith.constant 15 : i32
    %122 = tpu.dynamic_rotate %111 by %c15_i32_71 dim 1 : vector<16x256xf32>, i32 -> vector<16x256xf32>
    %123 = vector.broadcast %2 : vector<1x256xf32> to vector<16x256xf32>
    %124 = arith.mulf %122, %123 : vector<16x256xf32>
    %125 = arith.truncf %124 : vector<16x256xf32> to vector<16x256xbf16>
    %c32_72 = arith.constant 32 : index
    %c0_73 = arith.constant 0 : index
    %126 = vector.load %arg17[%c32_72, %c0_73] : memref<144x256xbf16, #tpu.memory_space<vmem>>, vector<16x256xbf16>
    tpu.vector_store %arg17[%c32_72, %c0_73], %125 {strides = array<i32>} : memref<144x256xbf16, #tpu.memory_space<vmem>>, vector<16x256xbf16>,
    %c1_i32_74 = arith.constant 1 : i32
    %127 = tpu.dynamic_rotate %111 by %c1_i32_74 dim 1 : vector<16x256xf32>, i32 -> vector<16x256xf32>
    %128 = vector.broadcast %3 : vector<1x256xf32> to vector<16x256xf32>
    %129 = arith.mulf %127, %128 : vector<16x256xf32>
    %130 = arith.truncf %129 : vector<16x256xf32> to vector<16x256xbf16>
    %c48_75 = arith.constant 48 : index
    %c0_76 = arith.constant 0 : index
    %131 = vector.load %arg17[%c48_75, %c0_76] : memref<144x256xbf16, #tpu.memory_space<vmem>>, vector<16x256xbf16>
    tpu.vector_store %arg17[%c48_75, %c0_76], %130 {strides = array<i32>} : memref<144x256xbf16, #tpu.memory_space<vmem>>, vector<16x256xbf16>,
    %132 = arith.truncf %111 : vector<16x256xf32> to vector<16x256xbf16>
    %c64_77 = arith.constant 64 : index
    %c0_78 = arith.constant 0 : index
    %133 = vector.load %arg17[%c64_77, %c0_78] : memref<144x256xbf16, #tpu.memory_space<vmem>>, vector<16x256xbf16>
    tpu.vector_store %arg17[%c64_77, %c0_78], %132 {strides = array<i32>} : memref<144x256xbf16, #tpu.memory_space<vmem>>, vector<16x256xbf16>,
    %c255_i32_79 = arith.constant 255 : i32
    %134 = tpu.dynamic_rotate %111 by %c255_i32_79 dim 1 : vector<16x256xf32>, i32 -> vector<16x256xf32>
    %135 = vector.broadcast %4 : vector<1x256xf32> to vector<16x256xf32>
    %136 = arith.mulf %134, %135 : vector<16x256xf32>
    %137 = arith.truncf %136 : vector<16x256xf32> to vector<16x256xbf16>
    %c80_80 = arith.constant 80 : index
    %c0_81 = arith.constant 0 : index
    %138 = vector.load %arg17[%c80_80, %c0_81] : memref<144x256xbf16, #tpu.memory_space<vmem>>, vector<16x256xbf16>
    tpu.vector_store %arg17[%c80_80, %c0_81], %137 {strides = array<i32>} : memref<144x256xbf16, #tpu.memory_space<vmem>>, vector<16x256xbf16>,
    %c241_i32_82 = arith.constant 241 : i32
    %139 = tpu.dynamic_rotate %111 by %c241_i32_82 dim 1 : vector<16x256xf32>, i32 -> vector<16x256xf32>
    %140 = vector.broadcast %5 : vector<1x256xf32> to vector<16x256xf32>
    %141 = arith.mulf %139, %140 : vector<16x256xf32>
    %142 = arith.truncf %141 : vector<16x256xf32> to vector<16x256xbf16>
    %c96_83 = arith.constant 96 : index
    %c0_84 = arith.constant 0 : index
    %143 = vector.load %arg17[%c96_83, %c0_84] : memref<144x256xbf16, #tpu.memory_space<vmem>>, vector<16x256xbf16>
    tpu.vector_store %arg17[%c96_83, %c0_84], %142 {strides = array<i32>} : memref<144x256xbf16, #tpu.memory_space<vmem>>, vector<16x256xbf16>,
    %c240_i32_85 = arith.constant 240 : i32
    %144 = tpu.dynamic_rotate %111 by %c240_i32_85 dim 1 : vector<16x256xf32>, i32 -> vector<16x256xf32>
    %145 = vector.broadcast %6 : vector<1x256xf32> to vector<16x256xf32>
    %146 = arith.mulf %144, %145 : vector<16x256xf32>
    %147 = arith.truncf %146 : vector<16x256xf32> to vector<16x256xbf16>
    %c112_86 = arith.constant 112 : index
    %c0_87 = arith.constant 0 : index
    %148 = vector.load %arg17[%c112_86, %c0_87] : memref<144x256xbf16, #tpu.memory_space<vmem>>, vector<16x256xbf16>
    tpu.vector_store %arg17[%c112_86, %c0_87], %147 {strides = array<i32>} : memref<144x256xbf16, #tpu.memory_space<vmem>>, vector<16x256xbf16>,
    %c239_i32_88 = arith.constant 239 : i32
    %149 = tpu.dynamic_rotate %111 by %c239_i32_88 dim 1 : vector<16x256xf32>, i32 -> vector<16x256xf32>
    %150 = vector.broadcast %7 : vector<1x256xf32> to vector<16x256xf32>
    %151 = arith.mulf %149, %150 : vector<16x256xf32>
    %152 = arith.truncf %151 : vector<16x256xf32> to vector<16x256xbf16>
    %c128_89 = arith.constant 128 : index
    %c0_90 = arith.constant 0 : index
    %153 = vector.load %arg17[%c128_89, %c0_90] : memref<144x256xbf16, #tpu.memory_space<vmem>>, vector<16x256xbf16>
    tpu.vector_store %arg17[%c128_89, %c0_90], %152 {strides = array<i32>} : memref<144x256xbf16, #tpu.memory_space<vmem>>, vector<16x256xbf16>,
    %c0_91 = arith.constant 0 : index
    %c0_92 = arith.constant 0 : index
    %154 = vector.load %arg8[%c0_91, %c0_92] : memref<16x144xbf16, #tpu.memory_space<vmem>>, vector<16x144xbf16>
    %c0_93 = arith.constant 0 : index
    %c0_94 = arith.constant 0 : index
    %155 = vector.load %arg17[%c0_93, %c0_94] : memref<144x256xbf16, #tpu.memory_space<vmem>>, vector<144x256xbf16>
    %cst_95 = arith.constant dense<0.000000e+00> : vector<16x256xf32>
    %156 = tpu.matmul %154, %155, %cst_95 {dimension_numbers = #tpu.dot_dimension_numbers<[1], [0], [0], [1], [0, 0, 1, 1], [], []>} : vector<16x144xbf16>, vector<144x256xbf16>, vector<16x256xf32> -> vector<16x256xf32>
    %c0_96 = arith.constant 0 : index
    %c0_97 = arith.constant 0 : index
    %157 = vector.load %arg9[%c0_96, %c0_97] : memref<16x1xf32, #tpu.memory_space<vmem>>, vector<16x1xf32>
    %158 = vector.broadcast %157 : vector<16x1xf32> to vector<16x256xf32>
    %159 = arith.addf %156, %158 : vector<16x256xf32>
    %160 = vector.extract_strided_slice %59 {offsets = [0, 0], sizes = [16, 256], strides = [1, 1]} : vector<32x256xf32> to vector<16x256xf32>
    %161 = arith.mulf %160, %159 : vector<16x256xf32>
    %162 = vector.extract_strided_slice %59 {offsets = [16, 0], sizes = [16, 256], strides = [1, 1]} : vector<32x256xf32> to vector<16x256xf32>
    %163 = arith.addf %161, %162 : vector<16x256xf32>
    %c17_i32_98 = arith.constant 17 : i32
    %164 = tpu.dynamic_rotate %163 by %c17_i32_98 dim 1 : vector<16x256xf32>, i32 -> vector<16x256xf32>
    %165 = arith.truncf %164 : vector<16x256xf32> to vector<16x256xbf16>
    %c0_99 = arith.constant 0 : index
    %c0_100 = arith.constant 0 : index
    %166 = vector.load %arg17[%c0_99, %c0_100] : memref<144x256xbf16, #tpu.memory_space<vmem>>, vector<16x256xbf16>
    tpu.vector_store %arg17[%c0_99, %c0_100], %165 {strides = array<i32>} : memref<144x256xbf16, #tpu.memory_space<vmem>>, vector<16x256xbf16>,
    %c16_i32_101 = arith.constant 16 : i32
    %167 = tpu.dynamic_rotate %163 by %c16_i32_101 dim 1 : vector<16x256xf32>, i32 -> vector<16x256xf32>
    %168 = arith.truncf %167 : vector<16x256xf32> to vector<16x256xbf16>
    %c16_102 = arith.constant 16 : index
    %c0_103 = arith.constant 0 : index
    %169 = vector.load %arg17[%c16_102, %c0_103] : memref<144x256xbf16, #tpu.memory_space<vmem>>, vector<16x256xbf16>
    tpu.vector_store %arg17[%c16_102, %c0_103], %168 {strides = array<i32>} : memref<144x256xbf16, #tpu.memory_space<vmem>>, vector<16x256xbf16>,
    %c15_i32_104 = arith.constant 15 : i32
    %170 = tpu.dynamic_rotate %163 by %c15_i32_104 dim 1 : vector<16x256xf32>, i32 -> vector<16x256xf32>
    %171 = arith.truncf %170 : vector<16x256xf32> to vector<16x256xbf16>
    %c32_105 = arith.constant 32 : index
    %c0_106 = arith.constant 0 : index
    %172 = vector.load %arg17[%c32_105, %c0_106] : memref<144x256xbf16, #tpu.memory_space<vmem>>, vector<16x256xbf16>
    tpu.vector_store %arg17[%c32_105, %c0_106], %171 {strides = array<i32>} : memref<144x256xbf16, #tpu.memory_space<vmem>>, vector<16x256xbf16>,
    %c1_i32_107 = arith.constant 1 : i32
    %173 = tpu.dynamic_rotate %163 by %c1_i32_107 dim 1 : vector<16x256xf32>, i32 -> vector<16x256xf32>
    %174 = arith.truncf %173 : vector<16x256xf32> to vector<16x256xbf16>
    %c48_108 = arith.constant 48 : index
    %c0_109 = arith.constant 0 : index
    %175 = vector.load %arg17[%c48_108, %c0_109] : memref<144x256xbf16, #tpu.memory_space<vmem>>, vector<16x256xbf16>
    tpu.vector_store %arg17[%c48_108, %c0_109], %174 {strides = array<i32>} : memref<144x256xbf16, #tpu.memory_space<vmem>>, vector<16x256xbf16>,
    %176 = arith.truncf %163 : vector<16x256xf32> to vector<16x256xbf16>
    %c64_110 = arith.constant 64 : index
    %c0_111 = arith.constant 0 : index
    %177 = vector.load %arg17[%c64_110, %c0_111] : memref<144x256xbf16, #tpu.memory_space<vmem>>, vector<16x256xbf16>
    tpu.vector_store %arg17[%c64_110, %c0_111], %176 {strides = array<i32>} : memref<144x256xbf16, #tpu.memory_space<vmem>>, vector<16x256xbf16>,
    %c255_i32_112 = arith.constant 255 : i32
    %178 = tpu.dynamic_rotate %163 by %c255_i32_112 dim 1 : vector<16x256xf32>, i32 -> vector<16x256xf32>
    %179 = arith.truncf %178 : vector<16x256xf32> to vector<16x256xbf16>
    %c80_113 = arith.constant 80 : index
    %c0_114 = arith.constant 0 : index
    %180 = vector.load %arg17[%c80_113, %c0_114] : memref<144x256xbf16, #tpu.memory_space<vmem>>, vector<16x256xbf16>
    tpu.vector_store %arg17[%c80_113, %c0_114], %179 {strides = array<i32>} : memref<144x256xbf16, #tpu.memory_space<vmem>>, vector<16x256xbf16>,
    %c241_i32_115 = arith.constant 241 : i32
    %181 = tpu.dynamic_rotate %163 by %c241_i32_115 dim 1 : vector<16x256xf32>, i32 -> vector<16x256xf32>
    %182 = arith.truncf %181 : vector<16x256xf32> to vector<16x256xbf16>
    %c96_116 = arith.constant 96 : index
    %c0_117 = arith.constant 0 : index
    %183 = vector.load %arg17[%c96_116, %c0_117] : memref<144x256xbf16, #tpu.memory_space<vmem>>, vector<16x256xbf16>
    tpu.vector_store %arg17[%c96_116, %c0_117], %182 {strides = array<i32>} : memref<144x256xbf16, #tpu.memory_space<vmem>>, vector<16x256xbf16>,
    %c240_i32_118 = arith.constant 240 : i32
    %184 = tpu.dynamic_rotate %163 by %c240_i32_118 dim 1 : vector<16x256xf32>, i32 -> vector<16x256xf32>
    %185 = arith.truncf %184 : vector<16x256xf32> to vector<16x256xbf16>
    %c112_119 = arith.constant 112 : index
    %c0_120 = arith.constant 0 : index
    %186 = vector.load %arg17[%c112_119, %c0_120] : memref<144x256xbf16, #tpu.memory_space<vmem>>, vector<16x256xbf16>
    tpu.vector_store %arg17[%c112_119, %c0_120], %185 {strides = array<i32>} : memref<144x256xbf16, #tpu.memory_space<vmem>>, vector<16x256xbf16>,
    %c239_i32_121 = arith.constant 239 : i32
    %187 = tpu.dynamic_rotate %163 by %c239_i32_121 dim 1 : vector<16x256xf32>, i32 -> vector<16x256xf32>
    %188 = arith.truncf %187 : vector<16x256xf32> to vector<16x256xbf16>
    %c128_122 = arith.constant 128 : index
    %c0_123 = arith.constant 0 : index
    %189 = vector.load %arg17[%c128_122, %c0_123] : memref<144x256xbf16, #tpu.memory_space<vmem>>, vector<16x256xbf16>
    tpu.vector_store %arg17[%c128_122, %c0_123], %188 {strides = array<i32>} : memref<144x256xbf16, #tpu.memory_space<vmem>>, vector<16x256xbf16>,
    %c0_124 = arith.constant 0 : index
    %c0_125 = arith.constant 0 : index
    %190 = vector.load %arg10[%c0_124, %c0_125] : memref<16x144xbf16, #tpu.memory_space<vmem>>, vector<16x144xbf16>
    %c0_126 = arith.constant 0 : index
    %c0_127 = arith.constant 0 : index
    %191 = vector.load %arg17[%c0_126, %c0_127] : memref<144x256xbf16, #tpu.memory_space<vmem>>, vector<144x256xbf16>
    %cst_128 = arith.constant dense<0.000000e+00> : vector<16x256xf32>
    %192 = tpu.matmul %190, %191, %cst_128 {dimension_numbers = #tpu.dot_dimension_numbers<[1], [0], [0], [1], [0, 0, 1, 1], [], []>} : vector<16x144xbf16>, vector<144x256xbf16>, vector<16x256xf32> -> vector<16x256xf32>
    %c0_129 = arith.constant 0 : index
    %c0_130 = arith.constant 0 : index
    %193 = vector.load %arg11[%c0_129, %c0_130] : memref<16x1xf32, #tpu.memory_space<vmem>>, vector<16x1xf32>
    %194 = vector.broadcast %193 : vector<16x1xf32> to vector<16x256xf32>
    %195 = arith.addf %192, %194 : vector<16x256xf32>
    %c255_i32_131 = arith.constant 255 : i32
    %196 = tpu.dynamic_rotate %195 by %c255_i32_131 dim 1 : vector<16x256xf32>, i32 -> vector<16x256xf32>
    %197 = arith.maximumf %195, %196 : vector<16x256xf32>
    %c240_i32_132 = arith.constant 240 : i32
    %198 = tpu.dynamic_rotate %195 by %c240_i32_132 dim 1 : vector<16x256xf32>, i32 -> vector<16x256xf32>
    %c239_i32_133 = arith.constant 239 : i32
    %199 = tpu.dynamic_rotate %195 by %c239_i32_133 dim 1 : vector<16x256xf32>, i32 -> vector<16x256xf32>
    %200 = arith.maximumf %198, %199 : vector<16x256xf32>
    %201 = arith.maximumf %197, %200 : vector<16x256xf32>
    %cst_134 = arith.constant 0.000000e+00 : f32
    %202 = vector.broadcast %cst_134 : f32 to vector<16x256xf32>
    %203 = arith.maximumf %201, %202 : vector<16x256xf32>
    %c0_135 = arith.constant 0 : index
    %c0_136 = arith.constant 0 : index
    %c0_137 = arith.constant 0 : index
    %204 = vector.load %arg12[%c0_135, %c0_136, %c0_137] : memref<16x16x256xbf16, #tpu.memory_space<vmem>>, vector<4x16x256xbf16>
    %205 = arith.extf %204 : vector<4x16x256xbf16> to vector<4x16x256xf32>
    %206 = vector.extract_strided_slice %203 {offsets = [0, 0], sizes = [4, 256], strides = [1, 1]} : vector<16x256xf32> to vector<4x256xf32>
    %207 = vector.shape_cast %206 : vector<4x256xf32> to vector<4x1x256xf32>
    %208 = vector.broadcast %207 : vector<4x1x256xf32> to vector<4x16x256xf32>
    %209 = arith.mulf %205, %208 : vector<4x16x256xf32>
    %cst_138 = arith.constant dense<0.000000e+00> : vector<4x16xf32>
    %210 = vector.multi_reduction <add>, %209, %cst_138 [2] : vector<4x16x256xf32> to vector<4x16xf32>
    %211 = vector.shape_cast %210 : vector<4x16xf32> to vector<4x16x1xf32>
    %cst_139 = arith.constant dense<0.000000e+00> : vector<16x1xf32>
    %212 = vector.multi_reduction <add>, %211, %cst_139 [0] : vector<4x16x1xf32> to vector<16x1xf32>
    %c4 = arith.constant 4 : index
    %c0_140 = arith.constant 0 : index
    %c0_141 = arith.constant 0 : index
    %213 = vector.load %arg12[%c4, %c0_140, %c0_141] : memref<16x16x256xbf16, #tpu.memory_space<vmem>>, vector<4x16x256xbf16>
    %214 = arith.extf %213 : vector<4x16x256xbf16> to vector<4x16x256xf32>
    %215 = vector.extract_strided_slice %203 {offsets = [4, 0], sizes = [4, 256], strides = [1, 1]} : vector<16x256xf32> to vector<4x256xf32>
    %216 = vector.shape_cast %215 : vector<4x256xf32> to vector<4x1x256xf32>
    %217 = vector.broadcast %216 : vector<4x1x256xf32> to vector<4x16x256xf32>
    %218 = arith.mulf %214, %217 : vector<4x16x256xf32>
    %cst_142 = arith.constant dense<0.000000e+00> : vector<4x16xf32>
    %219 = vector.multi_reduction <add>, %218, %cst_142 [2] : vector<4x16x256xf32> to vector<4x16xf32>
    %220 = vector.shape_cast %219 : vector<4x16xf32> to vector<4x16x1xf32>
    %cst_143 = arith.constant dense<0.000000e+00> : vector<16x1xf32>
    %221 = vector.multi_reduction <add>, %220, %cst_143 [0] : vector<4x16x1xf32> to vector<16x1xf32>
    %222 = arith.addf %212, %221 : vector<16x1xf32>
    %c8_144 = arith.constant 8 : index
    %c0_145 = arith.constant 0 : index
    %c0_146 = arith.constant 0 : index
    %223 = vector.load %arg12[%c8_144, %c0_145, %c0_146] : memref<16x16x256xbf16, #tpu.memory_space<vmem>>, vector<4x16x256xbf16>
    %224 = arith.extf %223 : vector<4x16x256xbf16> to vector<4x16x256xf32>
    %225 = vector.extract_strided_slice %203 {offsets = [8, 0], sizes = [4, 256], strides = [1, 1]} : vector<16x256xf32> to vector<4x256xf32>
    %226 = vector.shape_cast %225 : vector<4x256xf32> to vector<4x1x256xf32>
    %227 = vector.broadcast %226 : vector<4x1x256xf32> to vector<4x16x256xf32>
    %228 = arith.mulf %224, %227 : vector<4x16x256xf32>
    %cst_147 = arith.constant dense<0.000000e+00> : vector<4x16xf32>
    %229 = vector.multi_reduction <add>, %228, %cst_147 [2] : vector<4x16x256xf32> to vector<4x16xf32>
    %230 = vector.shape_cast %229 : vector<4x16xf32> to vector<4x16x1xf32>
    %cst_148 = arith.constant dense<0.000000e+00> : vector<16x1xf32>
    %231 = vector.multi_reduction <add>, %230, %cst_148 [0] : vector<4x16x1xf32> to vector<16x1xf32>
    %232 = arith.addf %222, %231 : vector<16x1xf32>
    %c12 = arith.constant 12 : index
    %c0_149 = arith.constant 0 : index
    %c0_150 = arith.constant 0 : index
    %233 = vector.load %arg12[%c12, %c0_149, %c0_150] : memref<16x16x256xbf16, #tpu.memory_space<vmem>>, vector<4x16x256xbf16>
    %234 = arith.extf %233 : vector<4x16x256xbf16> to vector<4x16x256xf32>
    %235 = vector.extract_strided_slice %203 {offsets = [12, 0], sizes = [4, 256], strides = [1, 1]} : vector<16x256xf32> to vector<4x256xf32>
    %236 = vector.shape_cast %235 : vector<4x256xf32> to vector<4x1x256xf32>
    %237 = vector.broadcast %236 : vector<4x1x256xf32> to vector<4x16x256xf32>
    %238 = arith.mulf %234, %237 : vector<4x16x256xf32>
    %cst_151 = arith.constant dense<0.000000e+00> : vector<4x16xf32>
    %239 = vector.multi_reduction <add>, %238, %cst_151 [2] : vector<4x16x256xf32> to vector<4x16xf32>
    %240 = vector.shape_cast %239 : vector<4x16xf32> to vector<4x16x1xf32>
    %cst_152 = arith.constant dense<0.000000e+00> : vector<16x1xf32>
    %241 = vector.multi_reduction <add>, %240, %cst_152 [0] : vector<4x16x1xf32> to vector<16x1xf32>
    %242 = arith.addf %232, %241 : vector<16x1xf32>
    %c0_153 = arith.constant 0 : index
    %c0_154 = arith.constant 0 : index
    %243 = vector.load %arg13[%c0_153, %c0_154] : memref<16x1xf32, #tpu.memory_space<vmem>>, vector<16x1xf32>
    %244 = arith.addf %242, %243 : vector<16x1xf32>
    %cst_155 = arith.constant 0.000000e+00 : f32
    %245 = vector.broadcast %cst_155 : f32 to vector<16x1xf32>
    %246 = arith.maximumf %244, %245 : vector<16x1xf32>
    %c0_156 = arith.constant 0 : index
    %c0_157 = arith.constant 0 : index
    %247 = vector.load %arg14[%c0_156, %c0_157] : memref<16x1xf32, #tpu.memory_space<vmem>>, vector<16x1xf32>
    %248 = arith.mulf %246, %247 : vector<16x1xf32>
    %249 = vector.shape_cast %248 : vector<16x1xf32> to vector<1x16x1xf32>
    %cst_158 = arith.constant dense<0.000000e+00> : vector<1xf32>
    %250 = vector.multi_reduction <add>, %249, %cst_158 [1, 2] : vector<1x16x1xf32> to vector<1xf32>
    %251 = vector.shape_cast %250 : vector<1xf32> to vector<1x1x1xf32>
    %252 = vector.extract %251[0, 0, 0] : f32 from vector<1x1x1xf32>
    %c0_159 = arith.constant 0 : index
    %c0_160 = arith.constant 0 : index
    %253 = vector.load %arg15[%c0_159, %c0_160] : memref<1x1xf32, #tpu.memory_space<vmem>>, vector<1x1xf32>
    %254 = vector.broadcast %252 : f32 to vector<1x1xf32>
    %255 = arith.addf %254, %253 : vector<1x1xf32>
    %c0_161 = arith.constant 0 : index
    %c0_162 = arith.constant 0 : index
    %c0_163 = arith.constant 0 : index
    %256 = vector.load %arg16[%c0_161, %c0_162, %c0_163] : memref<1x1x1xf32, #tpu.memory_space<vmem>>, vector<1x1x1xf32>
    %257 = vector.shape_cast %256 : vector<1x1x1xf32> to vector<1x1xf32>
    %258 = vector.shape_cast %255 : vector<1x1xf32> to vector<1x1x1xf32>
    tpu.vector_store %arg16[%c0_161, %c0_162, %c0_163], %258 {strides = array<i32>} : memref<1x1x1xf32, #tpu.memory_space<vmem>>, vector<1x1x1xf32>,
    return
  }
  func.func @transform_0(%arg0: i32) -> (i32, i32) {
    %c0_i32 = arith.constant 0 : i32
    %c0_i32_0 = arith.constant 0 : i32
    %c0_i32_1 = arith.constant 0 : i32
    return %c0_i32, %c0_i32_0 : i32, i32
  }
  func.func @transform_1(%arg0: i32) -> (i32, i32, i32) {
    %c0_i32 = arith.constant 0 : i32
    %c0_i32_0 = arith.constant 0 : i32
    %c0_i32_1 = arith.constant 0 : i32
    return %arg0, %c0_i32, %c0_i32_0 : i32, i32, i32
  }
  func.func @transform_2(%arg0: i32) -> (i32, i32, i32) {
    %c0_i32 = arith.constant 0 : i32
    %c0_i32_0 = arith.constant 0 : i32
    %c0_i32_1 = arith.constant 0 : i32
    return %arg0, %c0_i32, %c0_i32_0 : i32, i32, i32
  }
  func.func @transform_3(%arg0: i32) -> (i32, i32) {
    %c0_i32 = arith.constant 0 : i32
    %c0_i32_0 = arith.constant 0 : i32
    %c0_i32_1 = arith.constant 0 : i32
    return %c0_i32, %c0_i32_0 : i32, i32
  }
  func.func @transform_4(%arg0: i32) -> (i32, i32) {
    %c0_i32 = arith.constant 0 : i32
    %c0_i32_0 = arith.constant 0 : i32
    %c0_i32_1 = arith.constant 0 : i32
    return %c0_i32, %c0_i32_0 : i32, i32
  }
  func.func @transform_5(%arg0: i32) -> (i32, i32) {
    %c0_i32 = arith.constant 0 : i32
    %c0_i32_0 = arith.constant 0 : i32
    %c0_i32_1 = arith.constant 0 : i32
    return %c0_i32, %c0_i32_0 : i32, i32
  }
  func.func @transform_6(%arg0: i32) -> (i32, i32) {
    %c0_i32 = arith.constant 0 : i32
    %c0_i32_0 = arith.constant 0 : i32
    %c0_i32_1 = arith.constant 0 : i32
    return %c0_i32, %c0_i32_0 : i32, i32
  }
  func.func @transform_7(%arg0: i32) -> (i32, i32) {
    %c0_i32 = arith.constant 0 : i32
    %c0_i32_0 = arith.constant 0 : i32
    %c0_i32_1 = arith.constant 0 : i32
    return %c0_i32, %c0_i32_0 : i32, i32
  }
  func.func @transform_8(%arg0: i32) -> (i32, i32) {
    %c0_i32 = arith.constant 0 : i32
    %c0_i32_0 = arith.constant 0 : i32
    %c0_i32_1 = arith.constant 0 : i32
    return %c0_i32, %c0_i32_0 : i32, i32
  }
  func.func @transform_9(%arg0: i32) -> (i32, i32) {
    %c0_i32 = arith.constant 0 : i32
    %c0_i32_0 = arith.constant 0 : i32
    %c0_i32_1 = arith.constant 0 : i32
    return %c0_i32, %c0_i32_0 : i32, i32
  }
  func.func @transform_10(%arg0: i32) -> (i32, i32) {
    %c0_i32 = arith.constant 0 : i32
    %c0_i32_0 = arith.constant 0 : i32
    %c0_i32_1 = arith.constant 0 : i32
    return %c0_i32, %c0_i32_0 : i32, i32
  }
  func.func @transform_11(%arg0: i32) -> (i32, i32, i32) {
    %c0_i32 = arith.constant 0 : i32
    %c0_i32_0 = arith.constant 0 : i32
    %c0_i32_1 = arith.constant 0 : i32
    %c0_i32_2 = arith.constant 0 : i32
    return %c0_i32, %c0_i32_0, %c0_i32_1 : i32, i32, i32
  }
  func.func @transform_12(%arg0: i32) -> (i32, i32) {
    %c0_i32 = arith.constant 0 : i32
    %c0_i32_0 = arith.constant 0 : i32
    %c0_i32_1 = arith.constant 0 : i32
    return %c0_i32, %c0_i32_0 : i32, i32
  }
  func.func @transform_13(%arg0: i32) -> (i32, i32) {
    %c0_i32 = arith.constant 0 : i32
    %c0_i32_0 = arith.constant 0 : i32
    %c0_i32_1 = arith.constant 0 : i32
    return %c0_i32, %c0_i32_0 : i32, i32
  }
  func.func @transform_14(%arg0: i32) -> (i32, i32) {
    %c0_i32 = arith.constant 0 : i32
    %c0_i32_0 = arith.constant 0 : i32
    %c0_i32_1 = arith.constant 0 : i32
    return %c0_i32, %c0_i32_0 : i32, i32
  }
  func.func @transform_15(%arg0: i32) -> (i32, i32, i32) {
    %c0_i32 = arith.constant 0 : i32
    %c0_i32_0 = arith.constant 0 : i32
    %c0_i32_1 = arith.constant 0 : i32
    return %arg0, %c0_i32, %c0_i32_0 : i32, i32, i32
  }
}

</mosaic_0001>

<bundles_post_ra>
// kernel: value_model_forward.1
= control target key start
LH: loop header
LB: loop body
LE: loop exit
PB: predicated region body
PF: predicated region fallthrough
CT: control target
= control target key end

     0   :  { %s3641_s20 = smov 0   ;;  %s4761_s0 = inlined_call_operand.vmem [shape: f32[9,256], index: 0, kind: input, shape index: {}]   ;;  %s4762_s1 = inlined_call_operand.vmem [shape: f32[2,16,256], index: 1, kind: input, shape index: {}]   ;;  %s4763_s2 = inlined_call_operand.vmem [shape: f32[2,16,256], index: 2, kind: input, shape index: {}]   ;;  %s4764_s3 = inlined_call_operand.vmem [shape: bf16[32,144], index: 3, kind: input, shape index: {}]   ;;  %s4765_s4 = inlined_call_operand.vmem [shape: f32[32,1], index: 4, kind: input, shape index: {}]   ;;  %s4766_s5 = inlined_call_operand.vmem [shape: bf16[16,144], index: 5, kind: input, shape index: {}]   ;;  %s4767_s6 = inlined_call_operand.vmem [shape: f32[16,1], index: 6, kind: input, shape index: {}]   ;;  %s4768_s7 = inlined_call_operand.vmem [shape: bf16[16,144], index: 7, kind: input, shape index: {}]   ;;  %s4769_s8 = inlined_call_operand.vmem [shape: f32[16,1], index: 8, kind: input, shape index: {}]   ;;  %s4770_s9 = inlined_call_operand.vmem [shape: bf16[16,144], index: 9, kind: input, shape index: {}]   ;;  %s4771_s10 = inlined_call_operand.vmem [shape: f32[16,1], index: 10, kind: input, shape index: {}]   ;;  %s4772_s11 = inlined_call_operand.vmem [shape: bf16[16,16,256], index: 11, kind: input, shape index: {}]   ;;  %s4773_s12 = inlined_call_operand.vmem [shape: f32[16,1], index: 12, kind: input, shape index: {}]   ;;  %s4774_s13 = inlined_call_operand.vmem [shape: f32[16,1], index: 13, kind: input, shape index: {}]   ;;  %s4775_s14 = inlined_call_operand.<no memory space> [shape: f32[1,1], index: 14, kind: input, shape index: {}]   ;;  %s4776_s15 = inlined_call_operand.vmem [shape: f32[2,1,1], index: 15, kind: output, shape index: {}]  }
   0x1   :  { %v20_v0 = vstv %s4775_s14 }
   0x2   :  { %21 = vst [vmem:[#allocation3] sm:$0x1] %v20_v0 }
   0x3 LB: > { %s3076_s21 = sadd.s32 4294967295, %s3546_s20   ;;  %p3080_p0 = scmp.ge.s32.totalorder %s3546_s20, 1  ;;  %s3546_s20 = sphi %s3641_s20, %s27_s20  }
   0x4   : > { %p449_p1 = scmp.lt.s32.totalorder %s3546_s20, 3 }
   0x6   : > { %p450_p2 = pnand %p3080_p0, %p449_p1 }
   0x7   : > { %p500_p3 = scmp.lt.s32.totalorder (!%p450_p2), %s3076_s21, 1  ;;  %s3548_s25 = smov (!%p450_p2), 112  }
   0x8   : > { %453 = sbr.rel (%p450_p2) target bundleno = 1705 (0x6a9), region = 80  ;;  %s3549_s26 = smov (!%p450_p2), 113  }
   0x9   : > { %s4787_s27 = smov (!%p450_p2), 127   ;;  %s4783_s28 = smov (!%p450_p2), 1  }
   0xa   : > { %s4781_s29 = smov (!%p450_p2), 15   ;;  %s4779_s30 = smov (!%p450_p2), 16  }
   0xb   : > { %s4777_s16 = smov (!%p450_p2), 17   ;;  %s4785_s19 = smov (!%p450_p2), 111  }
   0xc   : > { %s4790_s22 = smov (!%p450_p2), 17  }
   0xd   : > { %s4796_s21 = smov (!%p500_p3, %s3076_s21), 1  ;;  %v3554_v7 = vmov 0   ;;  %vm1039_vm0 = vcmask 130048   ;;  %v3527_v8 = vld [vmem:[%s4766_s5 + $0x4] ss:$8 sps:$4 sm:$0xff]   ;;  %v541_v15 = vlaneseq  ;;  %vm2999_vm9 = vcmask 7168  }
   0xe   : > { %s3277_s14 = sshll.u32 %s4796_s21, 5  ;;  %3444 = vset.pattern.permute.xlu1 %v3554_v7  ;;  %3443 = vset.pattern.permute.xlu0 %v3554_v7  ;;  %v1386_v9 = vld [vmem:[%s4767_s6 + $0x8] sm:$0xff]  ;;  %v1385_v10 = vld [vmem:[%s4767_s6] sm:$0xff]  ;;  %vm3015_vm10 = vcmask 0  }
   0xf   : > { %s504_s24 = scalar_lea.vmem %s4762_s1, %s3277_s14  ;;  %3172 = vmatprep.mubr.msk.bf16.mxu1 %vm1039_vm0, %v3527_v8  ;;  %v3796_v16 = vshrl.u32 %v541_v15, 7  ;;  %v3802_v17 = vand.u32 127, %v541_v15  ;;  %v3090_v22 = vld [vmem:[%s4761_s0 + $0x7] ss:$8 sm:$0x3] }
  0x10   : > { %v3657_v1 = vld [vmem:[%s504_s24 + $0x8] sm:$0xff]  ;;  %v3659_v2 = vld [vmem:[%s504_s24] sm:$0xff]  ;;  %v3665_v3 = vld [vmem:[%s504_s24 + $0x18] sm:$0xff] }
  0x11   : > { %1309 = vrot.lane.b32.xlu1 %v3657_v1, %s3548_s25  ;;  %1305 = vrot.lane.b32.xlu0 %v3659_v2, %s3548_s25  ;;  %v3667_v4 = vld [vmem:[%s504_s24 + $0x10] sm:$0xff]  ;;  %v3378_v5 = vpack.c.bf16 %v3665_v3, %v3657_v1  ;;  %v3809_v20 = vsub.s32 1, %v3796_v16  ;;  %v3812_v21 = vsub.s32 0, %v3796_v16  ;;  %vm809_vm1 = vcmp.lt.s32.totalorder %v3802_v17, 112  ;;  %v3530_v59 = vld [vmem:[%s4764_s3 + $0x4] ss:$8 sps:$4 sm:$0xff]  }
  0x12   : > { %v3377_v6 = vpack.c.bf16 %v3667_v4, %v3659_v2  ;;  %v3089_v37 = vld [vmem:[%s4761_s0 + $0x6] ss:$8 sm:$0x3]  ;;  %vm767_vm2 = vcmp.lt.s32.totalorder %v3802_v17, 113  ;;  %vm725_vm3 = vcmp.lt.s32.totalorder %v3802_v17, 127  ;;  %3132 = vmatprep.mubr.msk.bf16.mxu0 %vm1039_vm0, %v3530_v59  ;;  %vm669_vm4 = vcmp.lt.s32.totalorder %v3802_v17, 1 }
  0x13   : > { %v3823_v25 = vrot.slane %v3090_v22, %v3809_v20  ;;  %v3828_v27 = vrot.slane %v3090_v22, %v3812_v21  ;;  %v3853_v42 = vrot.slane %v3089_v37, %v3812_v21  ;;  %v3856_v43 = vrot.slane %v3089_v37, %v3809_v20  ;;  %v3088_v54 = vld [vmem:[%s4761_s0 + $0x5] ss:$8 sm:$0x3] }
  0x14   : > { %v3886_v60 = vrot.slane %v3088_v54, %v3812_v21  ;;  %v3889_v61 = vrot.slane %v3088_v54, %v3809_v20  ;;  %vm627_vm5 = vcmp.lt.s32.totalorder %v3802_v17, 15  ;;  %vm585_vm6 = vcmp.lt.s32.totalorder %v3802_v17, 16 }
  0x15   : > { %1311 = vrot.lane.b32.xlu1 %v3665_v3, %s3548_s25  ;;  %1307 = vrot.lane.b32.xlu0 %v3667_v4, %s3548_s25  ;;  %vm543_vm7 = vcmp.lt.s32.totalorder %v3802_v17, 17  ;;  %vm851_vm8 = vcmp.lt.s32.totalorder %v3802_v17, 111 }
  0x19   : > { %1277 = vrot.lane.b32.xlu1 %v3667_v4, %s3549_s26  ;;  %1275 = vrot.lane.b32.xlu0 %v3659_v2, %s3549_s26 }
  0x1d   : > { %1281 = vrot.lane.b32.xlu1 %v3665_v3, %s3549_s26  ;;  %1279 = vrot.lane.b32.xlu0 %v3657_v1, %s3549_s26 }
  0x21   : > { %1247 = vrot.lane.b32.xlu1 %v3667_v4, %s4787_s27  ;;  %1245 = vrot.lane.b32.xlu0 %v3659_v2, %s4787_s27 }
  0x25   : > { %1251 = vrot.lane.b32.xlu1 %v3665_v3, %s4787_s27  ;;  %1249 = vrot.lane.b32.xlu0 %v3657_v1, %s4787_s27 }
  0x29   : > { %1203 = vrot.lane.b32.xlu1 %v3667_v4, %s4783_s28  ;;  %1201 = vrot.lane.b32.xlu0 %v3659_v2, %s4783_s28 }
  0x2d   : > { %1207 = vrot.lane.b32.xlu1 %v3665_v3, %s4783_s28  ;;  %1205 = vrot.lane.b32.xlu0 %v3657_v1, %s4783_s28 }
  0x31   : > { %1173 = vrot.lane.b32.xlu1 %v3667_v4, %s4781_s29  ;;  %1171 = vrot.lane.b32.xlu0 %v3659_v2, %s4781_s29 }
  0x35   : > { %1177 = vrot.lane.b32.xlu1 %v3665_v3, %s4781_s29  ;;  %1175 = vrot.lane.b32.xlu0 %v3657_v1, %s4781_s29 }
  0x39   : > { %1143 = vrot.lane.b32.xlu1 %v3667_v4, %s4779_s30  ;;  %1141 = vrot.lane.b32.xlu0 %v3659_v2, %s4779_s30 }
  0x3d   : > { %1147 = vrot.lane.b32.xlu1 %v3665_v3, %s4779_s30  ;;  %1145 = vrot.lane.b32.xlu0 %v3657_v1, %s4779_s30  ;;  %s509_s30 = scalar_lea.vmem %s4763_s2, %s3277_s14  ;;  %s4789_s14 = smov 16  }
  0x3e   : > { %v3748_v11 = vld [vmem:[%s509_s30] sm:$0xff]  ;;  %v3750_v12 = vld [vmem:[%s509_s30 + $0x10] sm:$0xff]  ;;  %v3756_v13 = vld [vmem:[%s509_s30 + $0x8] sm:$0xff] }
  0x3f   : > { %v3758_v14 = vld [vmem:[%s509_s30 + $0x18] sm:$0xff]  ;;  %v3359_v19 = vpack.c.bf16 %v3750_v12, %v3748_v11  ;;  %s4793_s30 = smov 15  }
  0x40   : > { %v3360_v18 = vpack.c.bf16 %v3758_v14, %v3756_v13 }
  0x41   : > { %1113 = vrot.lane.b32.xlu1 %v3667_v4, %s4777_s16  ;;  %1111 = vrot.lane.b32.xlu0 %v3659_v2, %s4777_s16 }
  0x45   : > { %1117 = vrot.lane.b32.xlu1 %v3665_v3, %s4777_s16  ;;  %1115 = vrot.lane.b32.xlu0 %v3657_v1, %s4777_s16 }
  0x49   : > { %1337 = vrot.lane.b32.xlu1 %v3667_v4, %s4785_s19  ;;  %1335 = vrot.lane.b32.xlu0 %v3659_v2, %s4785_s19 }
  0x4d   : > { %1341 = vrot.lane.b32.xlu1 %v3665_v3, %s4785_s19  ;;  %1339 = vrot.lane.b32.xlu0 %v3657_v1, %s4785_s19  ;;  %v3086_v3 = vld [vmem:[%s4761_s0 + $0x2] ss:$8 sm:$0x3] }
  0x51   : > { %1394 = vperm.xlu1 %3444, %v1386_v9   ;;  %1389 = vperm.xlu0 %3443, %v1385_v10  }
  0x55   : > { %801 = vrot.lane.b32.xlu1 %v3748_v11, %s3548_s25  ;;  %803 = vrot.lane.b32.xlu0 %v3750_v12, %s3548_s25 }
  0x59   : > { %805 = vrot.lane.b32.xlu1 %v3756_v13, %s3548_s25  ;;  %807 = vrot.lane.b32.xlu0 %v3758_v14, %s3548_s25 }
  0x5d   : > { %759 = vrot.lane.b32.xlu1 %v3748_v11, %s3549_s26  ;;  %761 = vrot.lane.b32.xlu0 %v3750_v12, %s3549_s26 }
  0x61   : > { %763 = vrot.lane.b32.xlu1 %v3756_v13, %s3549_s26  ;;  %765 = vrot.lane.b32.xlu0 %v3758_v14, %s3549_s26 }
  0x65   : > { %717 = vrot.lane.b32.xlu1 %v3748_v11, %s4787_s27  ;;  %719 = vrot.lane.b32.xlu0 %v3750_v12, %s4787_s27 }
  0x69   : > { %721 = vrot.lane.b32.xlu1 %v3756_v13, %s4787_s27  ;;  %723 = vrot.lane.b32.xlu0 %v3758_v14, %s4787_s27 }
  0x6d   : > { %661 = vrot.lane.b32.xlu1 %v3748_v11, %s4783_s28  ;;  %663 = vrot.lane.b32.xlu0 %v3750_v12, %s4783_s28 }
  0x71   : > { %665 = vrot.lane.b32.xlu1 %v3756_v13, %s4783_s28  ;;  %667 = vrot.lane.b32.xlu0 %v3758_v14, %s4783_s28 }
  0x75   : > { %619 = vrot.lane.b32.xlu1 %v3748_v11, %s4781_s29  ;;  %621 = vrot.lane.b32.xlu0 %v3750_v12, %s4781_s29 }
  0x79   : > { %623 = vrot.lane.b32.xlu1 %v3756_v13, %s4781_s29  ;;  %625 = vrot.lane.b32.xlu0 %v3758_v14, %s4781_s29 }
  0x7d   : > { %577 = vrot.lane.b32.xlu1 %v3748_v11, %s4789_s14  ;;  %579 = vrot.lane.b32.xlu0 %v3750_v12, %s4789_s14 }
  0x81   : > { %581 = vrot.lane.b32.xlu1 %v3756_v13, %s4789_s14  ;;  %583 = vrot.lane.b32.xlu0 %v3758_v14, %s4789_s14 }
  0x83   : > { %v1310_v23 = vpop.permute.xlu1 %1309  ;;  %v1306_v24 = vpop.permute.xlu0 %1305 }
  0x84   : > { %v1315_v26 = vsel %vm809_vm1, %v1310_v23, %v1306_v24  ;;  %v1313_v28 = vsel %vm809_vm1, %v1306_v24, %v1310_v23  ;;  %v3087_v24 = vld [vmem:[%s4761_s0 + $0x3] ss:$8 sm:$0x3] }
  0x85   : > { %533 = vrot.lane.b32.xlu1 %v3748_v11, %s4790_s22  ;;  %535 = vrot.lane.b32.xlu0 %v3750_v12, %s4790_s22  ;;  %v1318_v33 = vmul.f32 %v1315_v26, %v3823_v25  ;;  %v1317_v35 = vmul.f32 %v1313_v28, %v3828_v27 }
  0x87   : > { %v1312_v29 = vpop.permute.xlu1 %1311  ;;  %v1308_v30 = vpop.permute.xlu0 %1307 }
  0x88   : > { %v1314_v31 = vsel %vm809_vm1, %v1308_v30, %v1312_v29  ;;  %v1316_v32 = vsel %vm809_vm1, %v1312_v29, %v1308_v30 }
  0x89   : > { %v1320_v34 = vmul.f32 %v1316_v32, %v3823_v25  ;;  %v1319_v36 = vmul.f32 %v1314_v31, %v3828_v27  ;;  %537 = vrot.lane.b32.xlu1 %v3756_v13, %s4790_s22  ;;  %539 = vrot.lane.b32.xlu0 %v3758_v14, %s4790_s22  ;;  %v3909_v31 = vrot.slane %v3087_v24, %v3812_v21 }
  0x8a   : > { %v3912_v32 = vrot.slane %v3087_v24, %v3809_v20 }
  0x8b   : > { %v1278_v38 = vpop.permute.xlu1 %1277  ;;  %v1276_v39 = vpop.permute.xlu0 %1275  ;;  %v3384_v40 = vpack.c.bf16 %v1320_v34, %v1318_v33  ;;  %v3383_v41 = vpack.c.bf16 %v1319_v36, %v1317_v35 }
  0x8d   : > { %1499 = vmatprep.subr.bf16.mxu1 %v3384_v40  ;;  %843 = vrot.lane.b32.xlu1 %v3748_v11, %s4785_s19 }
  0x8e   : > { %1500 = vmatpush1.bf16.msra.mxu1 %v3383_v41  ;;  %845 = vrot.lane.b32.xlu0 %v3750_v12, %s4785_s19 }
  0x8f   : > { %v1282_v44 = vpop.permute.xlu1 %1281  ;;  %v1280_v45 = vpop.permute.xlu0 %1279 }
  0x90   : > { %v1284_v46 = vsel %vm767_vm2, %v1278_v38, %v1282_v44  ;;  %v1286_v47 = vsel %vm767_vm2, %v1282_v44, %v1278_v38  ;;  %v1283_v48 = vsel %vm767_vm2, %v1276_v39, %v1280_v45  ;;  %v1285_v49 = vsel %vm767_vm2, %v1280_v45, %v1276_v39 }
  0x91   : > { %v1289_v50 = vmul.f32 %v1284_v46, %v3853_v42  ;;  %v1290_v51 = vmul.f32 %v1286_v47, %v3856_v43  ;;  %v1287_v52 = vmul.f32 %v1283_v48, %v3853_v42  ;;  %v1288_v53 = vmul.f32 %v1285_v49, %v3856_v43  ;;  %847 = vrot.lane.b32.xlu1 %v3756_v13, %s4785_s19 }
  0x92   : > { %849 = vrot.lane.b32.xlu0 %v3758_v14, %s4785_s19  ;;  %v3937_v47 = vrot.slane %v3086_v3, %v3812_v21  ;;  %v3940_v48 = vrot.slane %v3086_v3, %v3809_v20 }
  0x93   : > { %v1248_v55 = vpop.permute.xlu1 %1247  ;;  %v1246_v56 = vpop.permute.xlu0 %1245  ;;  %v3382_v57 = vpack.c.bf16 %v1290_v51, %v1288_v53  ;;  %v3381_v58 = vpack.c.bf16 %v1289_v50, %v1287_v52 }
  0x95   : > { %1501 = vmatprep.subr.bf16.mxu1 %v3382_v57 }
  0x96   : > { %1502 = vmatpush1.bf16.msra.mxu1 %v3381_v58 }
  0x97   : > { %v1252_v62 = vpop.permute.xlu1 %1251  ;;  %v1250_v63 = vpop.permute.xlu0 %1249 }
  0x98   : > { %v1254_v0 = vsel %vm725_vm3, %v1248_v55, %v1252_v62  ;;  %v1256_v7 = vsel %vm725_vm3, %v1252_v62, %v1248_v55  ;;  %v1253_v8 = vsel %vm725_vm3, %v1246_v56, %v1250_v63  ;;  %v1255_v9 = vsel %vm725_vm3, %v1250_v63, %v1246_v56  ;;  %v3085_v56 = vld [vmem:[%s4761_s0 + $0x1] ss:$8 sm:$0x3] }
  0x99   : > { %v1259_v10 = vmul.f32 %v1254_v0, %v3886_v60  ;;  %v1260_v15 = vmul.f32 %v1256_v7, %v3889_v61  ;;  %v1257_v22 = vmul.f32 %v1253_v8, %v3886_v60  ;;  %v1258_v23 = vmul.f32 %v1255_v9, %v3889_v61 }
  0x9a   : > { %v3959_v63 = vrot.slane %v3085_v56, %v3812_v21  ;;  %v3962_v0 = vrot.slane %v3085_v56, %v3809_v20 }
  0x9b   : > { %v1204_v26 = vpop.permute.xlu1 %1203  ;;  %v1202_v28 = vpop.permute.xlu0 %1201  ;;  %v3380_v29 = vpack.c.bf16 %v1260_v15, %v1258_v23  ;;  %v3379_v30 = vpack.c.bf16 %v1259_v10, %v1257_v22 }
  0x9d   : > { %1503 = vmatprep.subr.bf16.mxu1 %v3380_v29  ;;  %v514_v29 = vld [vmem:[%s4761_s0] ss:$8 sm:$0x3] }
  0x9e   : > { %1504 = vmatpush1.bf16.msra.mxu1 %v3379_v30 }
  0x9f   : > { %v1208_v33 = vpop.permute.xlu1 %1207  ;;  %v1206_v34 = vpop.permute.xlu0 %1205  ;;  %1505 = vmatprep.subr.bf16.mxu1 %v3378_v5 }
  0xa0   : > { %v1210_v35 = vsel %vm669_vm4, %v1204_v26, %v1208_v33  ;;  %v1212_v36 = vsel %vm669_vm4, %v1208_v33, %v1204_v26  ;;  %v1209_v37 = vsel %vm669_vm4, %v1202_v28, %v1206_v34  ;;  %v1211_v38 = vsel %vm669_vm4, %v1206_v34, %v1202_v28 }
  0xa1   : > { %v1215_v39 = vmul.f32 %v1212_v36, %v3909_v31  ;;  %v1216_v40 = vmul.f32 %v1210_v35, %v3912_v32  ;;  %v1213_v41 = vmul.f32 %v1211_v38, %v3909_v31  ;;  %v1214_v1 = vmul.f32 %v1209_v37, %v3912_v32 }
  0xa2   : > { %1506 = vmatpush1.bf16.msra.mxu1 %v3377_v6  ;;  %v3981_v36 = vrot.slane %v514_v29, %v3812_v21  ;;  %v3984_v37 = vrot.slane %v514_v29, %v3809_v20 }
  0xa3   : > { %v1174_v5 = vpop.permute.xlu1 %1173  ;;  %v1172_v44 = vpop.permute.xlu0 %1171  ;;  %v3376_v45 = vpack.c.bf16 %v1216_v40, %v1214_v1  ;;  %v3375_v46 = vpack.c.bf16 %v1215_v39, %v1213_v41 }
  0xa5   : > { %1507 = vmatprep.subr.bf16.mxu1 %v3376_v45 }
  0xa6   : > { %1508 = vmatpush1.bf16.msra.mxu1 %v3375_v46 }
  0xa7   : > { %v1178_v2 = vpop.permute.xlu1 %1177  ;;  %v1176_v4 = vpop.permute.xlu0 %1175 }
  0xa8   : > { %v1180_v6 = vsel %vm627_vm5, %v1174_v5, %v1178_v2  ;;  %v1182_v49 = vsel %vm627_vm5, %v1178_v2, %v1174_v5  ;;  %v1179_v50 = vsel %vm627_vm5, %v1172_v44, %v1176_v4  ;;  %v1181_v51 = vsel %vm627_vm5, %v1176_v4, %v1172_v44  ;;  %v3091_v2 = vld [vmem:[%s4761_s0 + $0x10] ss:$8 sm:$0x3] }
  0xa9   : > { %v1185_v52 = vmul.f32 %v1182_v49, %v3937_v47  ;;  %v1186_v53 = vmul.f32 %v1180_v6, %v3940_v48  ;;  %v1183_v54 = vmul.f32 %v1181_v51, %v3937_v47  ;;  %v1184_v55 = vmul.f32 %v1179_v50, %v3940_v48 }
  0xaa   : > { %v4003_v51 = vrot.slane %v3091_v2, %v3812_v21 }
  0xab   : > { %v1144_v57 = vpop.permute.xlu1 %1143  ;;  %v1142_v58 = vpop.permute.xlu0 %1141  ;;  %v3374_v59 = vpack.c.bf16 %v1186_v53, %v1184_v55  ;;  %v3373_v62 = vpack.c.bf16 %v1185_v52, %v1183_v54  ;;  %v4006_v52 = vrot.slane %v3091_v2, %v3809_v20 }
  0xad   : > { %1509 = vmatprep.subr.bf16.mxu1 %v3374_v59 }
  0xae   : > { %1510 = vmatpush1.bf16.msra.mxu1 %v3373_v62 }
  0xaf   : > { %v1148_v7 = vpop.permute.xlu1 %1147  ;;  %v1146_v8 = vpop.permute.xlu0 %1145 }
  0xb0   : > { %v1150_v9 = vsel %vm585_vm6, %v1144_v57, %v1148_v7  ;;  %v1152_v10 = vsel %vm585_vm6, %v1148_v7, %v1144_v57  ;;  %v1149_v15 = vsel %vm585_vm6, %v1142_v58, %v1146_v8  ;;  %v1151_v22 = vsel %vm585_vm6, %v1146_v8, %v1142_v58 }
  0xb1   : > { %v1155_v23 = vmul.f32 %v1152_v10, %v3959_v63  ;;  %v1156_v24 = vmul.f32 %v1150_v9, %v3962_v0  ;;  %v1153_v26 = vmul.f32 %v1151_v22, %v3959_v63  ;;  %v1154_v28 = vmul.f32 %v1149_v15, %v3962_v0  ;;  %v3525_v15 = vld [vmem:[%s4766_s5] ss:$8 sps:$4 sm:$0xff]  }
  0xb3   : > { %v1114_v30 = vpop.permute.xlu1 %1113  ;;  %v1112_v33 = vpop.permute.xlu0 %1111  ;;  %v3372_v34 = vpack.c.bf16 %v1156_v24, %v1154_v28  ;;  %v3371_v35 = vpack.c.bf16 %v1155_v23, %v1153_v26 }
  0xb5   : > { %1511 = vmatprep.subr.bf16.mxu1 %v3372_v34 }
  0xb6   : > { %1512 = vmatpush1.bf16.msra.mxu1 %v3371_v35 }
  0xb7   : > { %v1118_v38 = vpop.permute.xlu1 %1117  ;;  %v1116_v39 = vpop.permute.xlu0 %1115 }
  0xb8   : > { %v1120_v40 = vsel %vm543_vm7, %v1114_v30, %v1118_v38  ;;  %v1122_v41 = vsel %vm543_vm7, %v1118_v38, %v1114_v30  ;;  %v1119_v1 = vsel %vm543_vm7, %v1112_v33, %v1116_v39  ;;  %v1121_v3 = vsel %vm543_vm7, %v1116_v39, %v1112_v33 }
  0xb9   : > { %v1125_v5 = vmul.f32 %v1122_v41, %v3981_v36  ;;  %v1126_v44 = vmul.f32 %v1120_v40, %v3984_v37  ;;  %v1123_v45 = vmul.f32 %v1121_v3, %v3981_v36  ;;  %v1124_v46 = vmul.f32 %v1119_v1, %v3984_v37 }
  0xbb   : > { %v1338_v4 = vpop.permute.xlu1 %1337  ;;  %v1336_v6 = vpop.permute.xlu0 %1335  ;;  %v3370_v49 = vpack.c.bf16 %v1126_v44, %v1124_v46  ;;  %v3369_v50 = vpack.c.bf16 %v1125_v5, %v1123_v45 }
  0xbd   : > { %1513 = vmatprep.subr.bf16.mxu1 %v3370_v49 }
  0xbe   : > { %1514 = vmatpush1.bf16.msra.mxu1 %v3369_v50 }
  0xbf   : > { %v1342_v53 = vpop.permute.xlu1 %1341  ;;  %v1340_v54 = vpop.permute.xlu0 %1339 }
  0xc0   : > { %v1344_v55 = vsel %vm851_vm8, %v1338_v4, %v1342_v53  ;;  %v1346_v56 = vsel %vm851_vm8, %v1342_v53, %v1338_v4  ;;  %v1343_v57 = vsel %vm851_vm8, %v1336_v6, %v1340_v54  ;;  %v1345_v58 = vsel %vm851_vm8, %v1340_v54, %v1336_v6 }
  0xc1   : > { %v1349_v59 = vmul.f32 %v1344_v55, %v4003_v51  ;;  %v1350_v62 = vmul.f32 %v1346_v56, %v4006_v52  ;;  %v1347_v7 = vmul.f32 %v1343_v57, %v4003_v51  ;;  %v1348_v8 = vmul.f32 %v1345_v58, %v4006_v52 }
  0xc3   : > { %v3386_v9 = vpack.c.bf16 %v1350_v62, %v1348_v8  ;;  %v3385_v10 = vpack.c.bf16 %v1349_v59, %v1347_v7 }
  0xc5   : > { %1529 = vmatprep.subr.bf16.mxu1 %v3386_v9 }
  0xc6   : > { %1530 = vmatpush2.bf16.msra.mxu1 %v3385_v10 }
  0xc9   : > { %1532 = vmatmul.mubr.bf16.vlgmr.msra.gmra.mxu1 %v3525_v15 }
  0xcc   : > { %v4023_v22 = vpop.permute.xlu1 %1394  ;;  %v4025_v23 = vpop.permute.xlu0 %1389 }
  0xd0   : > { %v802_v24 = vpop.permute.xlu1 %801  ;;  %v804_v26 = vpop.permute.xlu0 %803 }
  0xd4   : > { %v806_v28 = vpop.permute.xlu1 %805  ;;  %v808_v29 = vpop.permute.xlu0 %807 }
  0xd5   : > { %v810_v30 = vsel %vm809_vm1, %v802_v24, %v806_v28  ;;  %v811_v33 = vsel %vm809_vm1, %v804_v26, %v808_v29  ;;  %v812_v34 = vsel %vm809_vm1, %v806_v28, %v802_v24  ;;  %v813_v35 = vsel %vm809_vm1, %v808_v29, %v804_v26 }
  0xd6   : > { %v826_v38 = vmul.f32 %v3823_v25, %v812_v34  ;;  %v828_v39 = vmul.f32 %v3823_v25, %v813_v35  ;;  %v825_v40 = vmul.f32 %v3828_v27, %v810_v30  ;;  %v827_v41 = vmul.f32 %v3828_v27, %v811_v33 }
  0xd8   : > { %v760_v1 = vpop.permute.xlu1 %759  ;;  %v762_v3 = vpop.permute.xlu0 %761  ;;  %v3366_v5 = vpack.c.bf16 %v828_v39, %v826_v38  ;;  %v3365_v44 = vpack.c.bf16 %v827_v41, %v825_v40 }
  0xda   : > { %1046 = vmatprep.subr.bf16.mxu0 %v3366_v5 }
  0xdb   : > { %1047 = vmatpush1.bf16.msra.mxu0 %v3365_v44 }
  0xdc   : > { %v764_v45 = vpop.permute.xlu1 %763  ;;  %v766_v46 = vpop.permute.xlu0 %765 }
  0xdd   : > { %v768_v2 = vsel %vm767_vm2, %v760_v1, %v764_v45  ;;  %v770_v4 = vsel %vm767_vm2, %v764_v45, %v760_v1  ;;  %v769_v6 = vsel %vm767_vm2, %v762_v3, %v766_v46  ;;  %v771_v49 = vsel %vm767_vm2, %v766_v46, %v762_v3 }
  0xde   : > { %v783_v50 = vmul.f32 %v3853_v42, %v768_v2  ;;  %v784_v53 = vmul.f32 %v3856_v43, %v770_v4  ;;  %v785_v54 = vmul.f32 %v3853_v42, %v769_v6  ;;  %v786_v55 = vmul.f32 %v3856_v43, %v771_v49 }
  0xe0   : > { %v718_v56 = vpop.permute.xlu1 %717  ;;  %v720_v57 = vpop.permute.xlu0 %719  ;;  %v3364_v58 = vpack.c.bf16 %v786_v55, %v784_v53  ;;  %v3363_v59 = vpack.c.bf16 %v785_v54, %v783_v50 }
  0xe2   : > { %1048 = vmatprep.subr.bf16.mxu0 %v3364_v58 }
  0xe3   : > { %1049 = vmatpush1.bf16.msra.mxu0 %v3363_v59 }
  0xe4   : > { %v722_v62 = vpop.permute.xlu1 %721  ;;  %v724_v7 = vpop.permute.xlu0 %723 }
  0xe5   : > { %v726_v8 = vsel %vm725_vm3, %v718_v56, %v722_v62  ;;  %v728_v9 = vsel %vm725_vm3, %v722_v62, %v718_v56  ;;  %v727_v10 = vsel %vm725_vm3, %v720_v57, %v724_v7  ;;  %v729_v15 = vsel %vm725_vm3, %v724_v7, %v720_v57 }
  0xe6   : > { %v741_v24 = vmul.f32 %v3886_v60, %v726_v8  ;;  %v742_v26 = vmul.f32 %v3889_v61, %v728_v9  ;;  %v743_v28 = vmul.f32 %v3886_v60, %v727_v10  ;;  %v744_v29 = vmul.f32 %v3889_v61, %v729_v15 }
  0xe8   : > { %v662_v30 = vpop.permute.xlu1 %661  ;;  %v664_v33 = vpop.permute.xlu0 %663  ;;  %v3362_v34 = vpack.c.bf16 %v744_v29, %v742_v26  ;;  %v3361_v35 = vpack.c.bf16 %v743_v28, %v741_v24 }
  0xea   : > { %1050 = vmatprep.subr.bf16.mxu0 %v3362_v34 }
  0xeb   : > { %1051 = vmatpush1.bf16.msra.mxu0 %v3361_v35 }
  0xec   : > { %v666_v38 = vpop.permute.xlu1 %665  ;;  %v668_v39 = vpop.permute.xlu0 %667  ;;  %1052 = vmatprep.subr.bf16.mxu0 %v3360_v18 }
  0xed   : > { %v670_v40 = vsel %vm669_vm4, %v662_v30, %v666_v38  ;;  %v672_v41 = vsel %vm669_vm4, %v666_v38, %v662_v30  ;;  %v671_v1 = vsel %vm669_vm4, %v664_v33, %v668_v39  ;;  %v673_v3 = vsel %vm669_vm4, %v668_v39, %v664_v33 }
  0xee   : > { %v685_v5 = vmul.f32 %v3909_v31, %v672_v41  ;;  %v686_v44 = vmul.f32 %v3912_v32, %v670_v40  ;;  %v687_v45 = vmul.f32 %v3909_v31, %v673_v3  ;;  %v688_v13 = vmul.f32 %v3912_v32, %v671_v1 }
  0xef   : > { %1053 = vmatpush1.bf16.msra.mxu0 %v3359_v19 }
  0xf0   : > { %v620_v14 = vpop.permute.xlu1 %619  ;;  %v622_v18 = vpop.permute.xlu0 %621  ;;  %v3358_v46 = vpack.c.bf16 %v688_v13, %v686_v44  ;;  %v3357_v2 = vpack.c.bf16 %v687_v45, %v685_v5 }
  0xf2   : > { %1054 = vmatprep.subr.bf16.mxu0 %v3358_v46 }
  0xf3   : > { %1055 = vmatpush1.bf16.msra.mxu0 %v3357_v2 }
  0xf4   : > { %v624_v4 = vpop.permute.xlu1 %623  ;;  %v626_v6 = vpop.permute.xlu0 %625 }
  0xf5   : > { %v628_v49 = vsel %vm627_vm5, %v620_v14, %v624_v4  ;;  %v630_v50 = vsel %vm627_vm5, %v624_v4, %v620_v14  ;;  %v629_v53 = vsel %vm627_vm5, %v622_v18, %v626_v6  ;;  %v631_v11 = vsel %vm627_vm5, %v626_v6, %v622_v18 }
  0xf6   : > { %v643_v12 = vmul.f32 %v3937_v47, %v630_v50  ;;  %v644_v19 = vmul.f32 %v3940_v48, %v628_v49  ;;  %v645_v54 = vmul.f32 %v3937_v47, %v631_v11  ;;  %v646_v55 = vmul.f32 %v3940_v48, %v629_v53 }
  0xf8   : > { %v578_v56 = vpop.permute.xlu1 %577  ;;  %v580_v57 = vpop.permute.xlu0 %579  ;;  %v3356_v58 = vpack.c.bf16 %v646_v55, %v644_v19  ;;  %v3355_v59 = vpack.c.bf16 %v645_v54, %v643_v12 }
  0xfa   : > { %1056 = vmatprep.subr.bf16.mxu0 %v3356_v58  ;;  %v3528_v58 = vld [vmem:[%s4764_s3] ss:$8 sps:$4 sm:$0xff]  }
  0xfb   : > { %1057 = vmatpush1.bf16.msra.mxu0 %v3355_v59  ;;  %v3531_v59 = vld [vmem:[%s4764_s3 + $0x14] ss:$8 sps:$4 sm:$0xff]  }
  0xfc   : > { %v582_v62 = vpop.permute.xlu1 %581  ;;  %v584_v7 = vpop.permute.xlu0 %583 }
  0xfd   : > { %v586_v8 = vsel %vm585_vm6, %v578_v56, %v582_v62  ;;  %v588_v9 = vsel %vm585_vm6, %v582_v62, %v578_v56  ;;  %v587_v10 = vsel %vm585_vm6, %v580_v57, %v584_v7  ;;  %v589_v15 = vsel %vm585_vm6, %v584_v7, %v580_v57  ;;  %v3533_v62 = vld [vmem:[%s4764_s3 + $0x10] ss:$8 sps:$4 sm:$0xff]  }
  0xfe   : > { %v601_v24 = vmul.f32 %v3959_v63, %v588_v9  ;;  %v602_v26 = vmul.f32 %v3962_v0, %v586_v8  ;;  %v603_v28 = vmul.f32 %v3959_v63, %v589_v15  ;;  %v604_v29 = vmul.f32 %v3962_v0, %v587_v10 }
 0x100   : > { %v534_v30 = vpop.permute.xlu1 %533  ;;  %v536_v33 = vpop.permute.xlu0 %535  ;;  %v3354_v34 = vpack.c.bf16 %v604_v29, %v602_v26  ;;  %v3353_v35 = vpack.c.bf16 %v603_v28, %v601_v24 }
 0x102   : > { %1058 = vmatprep.subr.bf16.mxu0 %v3354_v34 }
 0x103   : > { %1059 = vmatpush1.bf16.msra.mxu0 %v3353_v35 }
 0x104   : > { %v538_v38 = vpop.permute.xlu1 %537  ;;  %v540_v39 = vpop.permute.xlu0 %539 }
 0x105   : > { %v544_v40 = vsel %vm543_vm7, %v534_v30, %v538_v38  ;;  %v546_v41 = vsel %vm543_vm7, %v538_v38, %v534_v30  ;;  %v545_v1 = vsel %vm543_vm7, %v536_v33, %v540_v39  ;;  %v547_v3 = vsel %vm543_vm7, %v540_v39, %v536_v33  ;;  %v907_v38 = vld [vmem:[%s4765_s4] sm:$0xff]  ;;  %v908_v39 = vld [vmem:[%s4765_s4 + $0x8] sm:$0xff] }
 0x106   : > { %v559_v5 = vmul.f32 %v3981_v36, %v546_v41  ;;  %v560_v44 = vmul.f32 %v3984_v37, %v544_v40  ;;  %v561_v45 = vmul.f32 %v3981_v36, %v547_v3  ;;  %v562_v13 = vmul.f32 %v3984_v37, %v545_v1  ;;  %v909_v40 = vld [vmem:[%s4765_s4 + $0x10] sm:$0xff]  ;;  %v910_v41 = vld [vmem:[%s4765_s4 + $0x18] sm:$0xff]  ;;  %v1820_v1 = vld [vmem:[%s4769_s8] sm:$0xff] }
 0x107   : > { %v1821_v3 = vld [vmem:[%s4769_s8 + $0x8] sm:$0xff] }
 0x108   : > { %v844_v14 = vpop.permute.xlu1 %843  ;;  %v846_v18 = vpop.permute.xlu0 %845  ;;  %v3352_v46 = vpack.c.bf16 %v562_v13, %v560_v44  ;;  %v3351_v2 = vpack.c.bf16 %v561_v45, %v559_v5 }
 0x10a   : > { %1060 = vmatprep.subr.bf16.mxu0 %v3352_v46 }
 0x10b   : > { %1061 = vmatpush1.bf16.msra.mxu0 %v3351_v2 }
 0x10c   : > { %v848_v4 = vpop.permute.xlu1 %847  ;;  %v850_v6 = vpop.permute.xlu0 %849 }
 0x10d   : > { %v852_v49 = vsel %vm851_vm8, %v844_v14, %v848_v4  ;;  %v854_v50 = vsel %vm851_vm8, %v848_v4, %v844_v14  ;;  %v853_v53 = vsel %vm851_vm8, %v846_v18, %v850_v6  ;;  %v855_v11 = vsel %vm851_vm8, %v850_v6, %v846_v18 }
 0x10e   : > { %v867_v12 = vmul.f32 %v4003_v51, %v852_v49  ;;  %v868_v19 = vmul.f32 %v4006_v52, %v854_v50  ;;  %v869_v54 = vmul.f32 %v4003_v51, %v853_v53  ;;  %v870_v55 = vmul.f32 %v4006_v52, %v855_v11 }
 0x110   : > { %v3368_v56 = vpack.c.bf16 %v870_v55, %v868_v19  ;;  %v3367_v57 = vpack.c.bf16 %v869_v54, %v867_v12 }
 0x112   : > { %1076 = vmatprep.subr.bf16.mxu0 %v3368_v56 }
 0x113   : > { %1077 = vmatpush2.bf16.msra.mxu0 %v3367_v57 }
 0x116   : > { %1079 = vmatmul.mubr.bf16.vlgmr.msra.gmra.mxu0 %v3528_v58 }
 0x117   : > { %3133 = vmatprep.mubr.msk.bf16.mxu0 %vm1039_vm0, %v3531_v59 }
 0x11e   : > { %1089 = vmatmul.mubr.bf16.gmra.mxu0 %v3533_v62 }
 0x189   : > { %v1533_v7 = vpop.f32.mrf.mxu1 }
 0x18a   : > { %v1534_v8 = vadd.f32 %v1533_v7, %v4025_v23 }
 0x18b   : > { %v1535_v9 = vpop.f32.mrf.mxu1 }
 0x18c   : > { %v4140_v10 = vmax.f32 %v1534_v8, 0.0  ;;  %v1536_v24 = vadd.f32 %v1535_v9, %v4025_v23 }
 0x18d   : > { %v1537_v15 = vpop.f32.mrf.mxu1 }
 0x18e   : > { %v1538_v26 = vadd.f32 %v1537_v15, %v4023_v22  ;;  %1740 = vrot.lane.b32.xlu1 %v4140_v10, %s3548_s25  ;;  %v4149_v33 = vmax.f32 %v1536_v24, 0.0 }
 0x18f   : > { %v1539_v28 = vpop.f32.mrf.mxu1 }
 0x190   : > { %v4146_v29 = vmax.f32 %v1538_v26, 0.0  ;;  %v1540_v30 = vadd.f32 %v1539_v28, %v4023_v22  ;;  %v3536_v22 = vld [vmem:[%s4768_s7 + $0x4] ss:$8 sps:$4 sm:$0xff]  }
 0x191   : > { %3211 = vmatprep.mubr.msk.bf16.mxu0 %vm1039_vm0, %v3536_v22 }
 0x192   : > { %v4151_v34 = vmax.f32 %v1540_v30, 0.0  ;;  %1742 = vrot.lane.b32.xlu0 %v4146_v29, %s3548_s25  ;;  %1710 = vrot.lane.b32.xlu1 %v4140_v10, %s3549_s26  ;;  %v3395_v23 = vpack.c.bf16 %v4146_v29, %v4140_v10 }
 0x194   : > { %v3396_v35 = vpack.c.bf16 %v4151_v34, %v4149_v33 }
 0x196   : > { %1712 = vrot.lane.b32.xlu0 %v4146_v29, %s3549_s26  ;;  %1680 = vrot.lane.b32.xlu1 %v4140_v10, %s4787_s27 }
 0x19a   : > { %1682 = vrot.lane.b32.xlu0 %v4146_v29, %s4787_s27  ;;  %1636 = vrot.lane.b32.xlu1 %v4140_v10, %s4783_s28 }
 0x19e   : > { %1638 = vrot.lane.b32.xlu0 %v4146_v29, %s4783_s28  ;;  %1606 = vrot.lane.b32.xlu1 %v4140_v10, %s4781_s29 }
 0x1a2   : > { %1608 = vrot.lane.b32.xlu0 %v4146_v29, %s4781_s29  ;;  %1576 = vrot.lane.b32.xlu1 %v4140_v10, %s4789_s14 }
 0x1a6   : > { %1578 = vrot.lane.b32.xlu0 %v4146_v29, %s4789_s14  ;;  %1546 = vrot.lane.b32.xlu1 %v4140_v10, %s4790_s22 }
 0x1aa   : > { %1548 = vrot.lane.b32.xlu0 %v4146_v29, %s4790_s22  ;;  %1744 = vrot.lane.b32.xlu1 %v4149_v33, %s3548_s25 }
 0x1ae   : > { %1746 = vrot.lane.b32.xlu0 %v4151_v34, %s3548_s25  ;;  %1714 = vrot.lane.b32.xlu1 %v4149_v33, %s3549_s26 }
 0x1b2   : > { %1716 = vrot.lane.b32.xlu0 %v4151_v34, %s3549_s26  ;;  %1684 = vrot.lane.b32.xlu1 %v4149_v33, %s4787_s27 }
 0x1b6   : > { %1686 = vrot.lane.b32.xlu0 %v4151_v34, %s4787_s27  ;;  %1770 = vrot.lane.b32.xlu1 %v4140_v10, %s4785_s19 }
 0x1ba   : > { %1772 = vrot.lane.b32.xlu0 %v4146_v29, %s4785_s19  ;;  %1640 = vrot.lane.b32.xlu1 %v4149_v33, %s4783_s28 }
 0x1be   : > { %1642 = vrot.lane.b32.xlu0 %v4151_v34, %s4783_s28  ;;  %1610 = vrot.lane.b32.xlu1 %v4149_v33, %s4781_s29 }
 0x1c2   : > { %1612 = vrot.lane.b32.xlu0 %v4151_v34, %s4781_s29  ;;  %1580 = vrot.lane.b32.xlu1 %v4149_v33, %s4789_s14  ;;  %s4791_s29 = smov 127  }
 0x1c6   : > { %1582 = vrot.lane.b32.xlu0 %v4151_v34, %s4789_s14  ;;  %1550 = vrot.lane.b32.xlu1 %v4149_v33, %s4790_s22 }
 0x1ca   : > { %1552 = vrot.lane.b32.xlu0 %v4151_v34, %s4790_s22  ;;  %1774 = vrot.lane.b32.xlu1 %v4149_v33, %s4785_s19 }
 0x1ce   : > { %1776 = vrot.lane.b32.xlu0 %v4151_v34, %s4785_s19  ;;  %913 = vperm.xlu1 %3444, %v907_v38   ;;  %s4792_s19 = smov 1  }
 0x1d2   : > { %918 = vperm.xlu0 %3443, %v908_v39   ;;  %923 = vperm.xlu1 %3444, %v909_v40  }
 0x1d6   : > { %928 = vperm.xlu0 %3443, %v910_v41   ;;  %1824 = vperm.xlu1 %3444, %v1820_v1  }
 0x1da   : > { %1829 = vperm.xlu0 %3443, %v1821_v3  }
 0x200   : > { %v1741_v5 = vpop.permute.xlu1 %1740 }
 0x204   : > { %v1743_v44 = vpop.permute.xlu0 %1742  ;;  %v1711_v45 = vpop.permute.xlu1 %1710 }
 0x208   : > { %v1713_v13 = vpop.permute.xlu0 %1712  ;;  %v1681_v14 = vpop.permute.xlu1 %1680 }
 0x20c   : > { %v1683_v18 = vpop.permute.xlu0 %1682  ;;  %v1637_v46 = vpop.permute.xlu1 %1636 }
 0x210   : > { %v1639_v2 = vpop.permute.xlu0 %1638  ;;  %v4241_v4 = vpop.permute.xlu1 %1606 }
 0x214   : > { %v4243_v6 = vpop.permute.xlu0 %1608  ;;  %v4245_v49 = vpop.permute.xlu1 %1576 }
 0x218   : > { %v4247_v50 = vpop.permute.xlu0 %1578  ;;  %v4249_v53 = vpop.permute.xlu1 %1546 }
 0x21c   : > { %v4251_v11 = vpop.permute.xlu0 %1548  ;;  %v1745_v12 = vpop.permute.xlu1 %1744 }
 0x21d   : > { %v1748_v19 = vsel %vm809_vm1, %v1741_v5, %v1745_v12  ;;  %v1750_v54 = vsel %vm809_vm1, %v1745_v12, %v1741_v5 }
 0x21e   : > { %v1752_v59 = vmul.f32 %v1748_v19, %v3828_v27  ;;  %v1753_v62 = vmul.f32 %v1750_v54, %v3823_v25 }
 0x220   : > { %v1747_v55 = vpop.permute.xlu0 %1746  ;;  %v1715_v56 = vpop.permute.xlu1 %1714 }
 0x221   : > { %v1749_v57 = vsel %vm809_vm1, %v1743_v44, %v1747_v55  ;;  %v1751_v58 = vsel %vm809_vm1, %v1747_v55, %v1743_v44  ;;  %v1718_v9 = vsel %vm767_vm2, %v1711_v45, %v1715_v56  ;;  %v1720_v15 = vsel %vm767_vm2, %v1715_v56, %v1711_v45 }
 0x222   : > { %v1754_v7 = vmul.f32 %v1749_v57, %v3828_v27  ;;  %v1755_v8 = vmul.f32 %v1751_v58, %v3823_v25  ;;  %v1722_v27 = vmul.f32 %v1718_v9, %v3853_v42  ;;  %v1723_v25 = vmul.f32 %v1720_v15, %v3856_v43 }
 0x224   : > { %v3401_v24 = vpack.c.bf16 %v1754_v7, %v1752_v59  ;;  %v1717_v26 = vpop.permute.xlu0 %1716  ;;  %v1685_v28 = vpop.permute.xlu1 %1684  ;;  %v3402_v30 = vpack.c.bf16 %v1755_v8, %v1753_v62 }
 0x225   : > { %v1719_v22 = vsel %vm767_vm2, %v1713_v13, %v1717_v26  ;;  %v1721_v38 = vsel %vm767_vm2, %v1717_v26, %v1713_v13  ;;  %v1688_v41 = vsel %vm725_vm3, %v1681_v14, %v1685_v28  ;;  %v1690_v1 = vsel %vm725_vm3, %v1685_v28, %v1681_v14 }
 0x226   : > { %v1724_v39 = vmul.f32 %v1719_v22, %v3853_v42  ;;  %v1725_v40 = vmul.f32 %v1721_v38, %v3856_v43  ;;  %1934 = vmatprep.subr.bf16.mxu0 %v3402_v30  ;;  %v1692_v43 = vmul.f32 %v1688_v41, %v3886_v60  ;;  %v1693_v12 = vmul.f32 %v1690_v1, %v3889_v61 }
 0x227   : > { %1935 = vmatpush1.bf16.msra.mxu0 %v3401_v24 }
 0x228   : > { %v3399_v3 = vpack.c.bf16 %v1724_v39, %v1722_v27  ;;  %v1687_v5 = vpop.permute.xlu0 %1686  ;;  %v4281_v44 = vpop.permute.xlu1 %1770  ;;  %v3400_v45 = vpack.c.bf16 %v1725_v40, %v1723_v25 }
 0x229   : > { %v1689_v13 = vsel %vm725_vm3, %v1683_v18, %v1687_v5  ;;  %v1691_v42 = vsel %vm725_vm3, %v1687_v5, %v1683_v18 }
 0x22a   : > { %v1694_v19 = vmul.f32 %v1689_v13, %v3886_v60  ;;  %v1695_v14 = vmul.f32 %v1691_v42, %v3889_v61  ;;  %1936 = vmatprep.subr.bf16.mxu0 %v3400_v45 }
 0x22b   : > { %1937 = vmatpush1.bf16.msra.mxu0 %v3399_v3 }
 0x22c   : > { %v3397_v54 = vpack.c.bf16 %v1694_v19, %v1692_v43  ;;  %v4291_v55 = vpop.permute.xlu0 %1772  ;;  %v1641_v56 = vpop.permute.xlu1 %1640  ;;  %v3398_v57 = vpack.c.bf16 %v1695_v14, %v1693_v12 }
 0x22d   : > { %v1644_v58 = vsel %vm669_vm4, %v1637_v46, %v1641_v56  ;;  %v1646_v18 = vsel %vm669_vm4, %v1641_v56, %v1637_v46 }
 0x22e   : > { %1938 = vmatprep.subr.bf16.mxu0 %v3398_v57  ;;  %v1648_v7 = vmul.f32 %v1646_v18, %v3909_v31  ;;  %v1649_v8 = vmul.f32 %v1644_v58, %v3912_v32 }
 0x22f   : > { %1939 = vmatpush1.bf16.msra.mxu0 %v3397_v54 }
 0x230   : > { %v1643_v59 = vpop.permute.xlu0 %1642  ;;  %1940 = vmatprep.subr.bf16.mxu0 %v3396_v35  ;;  %v1611_v60 = vpop.permute.xlu1 %1610 }
 0x231   : > { %v1645_v61 = vsel %vm669_vm4, %v1639_v2, %v1643_v59  ;;  %v1647_v62 = vsel %vm669_vm4, %v1643_v59, %v1639_v2  ;;  %v1614_v33 = vsel %vm627_vm5, %v4241_v4, %v1611_v60  ;;  %v1616_v34 = vsel %vm627_vm5, %v1611_v60, %v4241_v4  ;;  %v3534_v59 = vld [vmem:[%s4768_s7] ss:$8 sps:$4 sm:$0xff]  }
 0x232   : > { %v1650_v9 = vmul.f32 %v1647_v62, %v3909_v31  ;;  %v1651_v46 = vmul.f32 %v1645_v61, %v3912_v32  ;;  %v1618_v26 = vmul.f32 %v1616_v34, %v3937_v47  ;;  %v1619_v4 = vmul.f32 %v1614_v33, %v3940_v48 }
 0x233   : > { %1941 = vmatpush1.bf16.msra.mxu0 %v3395_v23 }
 0x234   : > { %v3393_v35 = vpack.c.bf16 %v1650_v9, %v1648_v7  ;;  %v1613_v2 = vpop.permute.xlu0 %1612  ;;  %v1581_v15 = vpop.permute.xlu1 %1580  ;;  %v3394_v24 = vpack.c.bf16 %v1651_v46, %v1649_v8 }
 0x235   : > { %v1615_v31 = vsel %vm627_vm5, %v4243_v6, %v1613_v2  ;;  %v1617_v32 = vsel %vm627_vm5, %v1613_v2, %v4243_v6  ;;  %v1584_v29 = vsel %vm585_vm6, %v4245_v49, %v1581_v15  ;;  %v1586_v23 = vsel %vm585_vm6, %v1581_v15, %v4245_v49 }
 0x236   : > { %v1620_v28 = vmul.f32 %v1617_v32, %v3937_v47  ;;  %v1621_v10 = vmul.f32 %v1615_v31, %v3940_v48  ;;  %1942 = vmatprep.subr.bf16.mxu0 %v3394_v24  ;;  %v1588_v27 = vmul.f32 %v1586_v23, %v3959_v63  ;;  %v1589_v25 = vmul.f32 %v1584_v29, %v3962_v0 }
 0x237   : > { %1943 = vmatpush1.bf16.msra.mxu0 %v3393_v35 }
 0x238   : > { %v3391_v30 = vpack.c.bf16 %v1620_v28, %v1618_v26  ;;  %v1583_v6 = vpop.permute.xlu0 %1582  ;;  %v1551_v22 = vpop.permute.xlu1 %1550  ;;  %v3392_v38 = vpack.c.bf16 %v1621_v10, %v1619_v4 }
 0x239   : > { %v1585_v47 = vsel %vm585_vm6, %v4247_v50, %v1583_v6  ;;  %v1587_v48 = vsel %vm585_vm6, %v1583_v6, %v4247_v50  ;;  %v1554_v40 = vsel %vm543_vm7, %v4249_v53, %v1551_v22  ;;  %v1556_v41 = vsel %vm543_vm7, %v1551_v22, %v4249_v53 }
 0x23a   : > { %v1590_v39 = vmul.f32 %v1587_v48, %v3959_v63  ;;  %v1591_v49 = vmul.f32 %v1585_v47, %v3962_v0  ;;  %1944 = vmatprep.subr.bf16.mxu0 %v3392_v38  ;;  %v1558_v45 = vmul.f32 %v1556_v41, %v3981_v36  ;;  %v1559_v13 = vmul.f32 %v1554_v40, %v3984_v37 }
 0x23b   : > { %1945 = vmatpush1.bf16.msra.mxu0 %v3391_v30 }
 0x23c   : > { %v3389_v1 = vpack.c.bf16 %v1590_v39, %v1588_v27  ;;  %v1553_v50 = vpop.permute.xlu0 %1552  ;;  %v1775_v3 = vpop.permute.xlu1 %1774  ;;  %v3390_v5 = vpack.c.bf16 %v1591_v49, %v1589_v25 }
 0x23d   : > { %v1555_v63 = vsel %vm543_vm7, %v4251_v11, %v1553_v50  ;;  %v1557_v0 = vsel %vm543_vm7, %v1553_v50, %v4251_v11  ;;  %v1778_v43 = vsel %vm851_vm8, %v4281_v44, %v1775_v3  ;;  %v1780_v12 = vsel %vm851_vm8, %v1775_v3, %v4281_v44 }
 0x23e   : > { %v1560_v42 = vmul.f32 %v1557_v0, %v3981_v36  ;;  %v1561_v53 = vmul.f32 %v1555_v63, %v3984_v37  ;;  %1946 = vmatprep.subr.bf16.mxu0 %v3390_v5  ;;  %v1782_v37 = vmul.f32 %v1778_v43, %v4003_v51  ;;  %v1783_v56 = vmul.f32 %v1780_v12, %v4006_v52 }
 0x23f   : > { %1947 = vmatpush1.bf16.msra.mxu0 %v3389_v1 }
 0x240   : > { %v3387_v19 = vpack.c.bf16 %v1560_v42, %v1558_v45  ;;  %v1777_v11 = vpop.permute.xlu0 %1776  ;;  %v3388_v14 = vpack.c.bf16 %v1561_v53, %v1559_v13 }
 0x241   : > { %v1779_v54 = vsel %vm851_vm8, %v4291_v55, %v1777_v11  ;;  %v1781_v36 = vsel %vm851_vm8, %v1777_v11, %v4291_v55  ;;  %v1080_v55 = vpop.f32.mrf.mxu0 }
 0x242   : > { %v1784_v57 = vmul.f32 %v1779_v54, %v4003_v51  ;;  %v1785_v44 = vmul.f32 %v1781_v36, %v4006_v52  ;;  %1948 = vmatprep.subr.bf16.mxu0 %v3388_v14  ;;  %v3537_v14 = vld [vmem:[%s4770_s9 + $0x4] ss:$8 sps:$4 sm:$0xff]  }
 0x243   : > { %1949 = vmatpush1.bf16.msra.mxu0 %v3387_v19  ;;  %v1082_v60 = vpop.f32.mrf.mxu0  ;;  %v2227_v54 = vld [vmem:[%s4771_s10] sm:$0xff]  ;;  %3250 = vmatprep.mubr.msk.bf16.mxu1 %vm1039_vm0, %v3537_v14  ;;  %v2228_v36 = vld [vmem:[%s4771_s10 + $0x8] sm:$0xff] }
 0x244   : > { %v3403_v58 = vpack.c.bf16 %v1784_v57, %v1782_v37  ;;  %v3404_v18 = vpack.c.bf16 %v1785_v44, %v1783_v56 }
 0x245   : > { %v1084_v61 = vpop.f32.mrf.mxu0 }
 0x246   : > { %1964 = vmatprep.subr.bf16.mxu0 %v3404_v18 }
 0x247   : > { %1965 = vmatpush2.bf16.msra.mxu0 %v3403_v58  ;;  %v1086_v62 = vpop.f32.mrf.mxu0 }
 0x249   : > { %v1090_v7 = vpop.f32.mrf.mxu0  ;;  %v914_v8 = vpop.permute.xlu1 %913 }
 0x24a   : > { %1967 = vmatmul.mubr.bf16.vlgmr.msra.gmra.mxu0 %v3534_v59  ;;  %v1081_v35 = vadd.f32 %v1080_v55, %v914_v8  ;;  %v1083_v2 = vadd.f32 %v1082_v60, %v914_v8 }
 0x24b   : > { %v1092_v51 = vpop.f32.mrf.mxu0 }
 0x24c   : > { %v1099_v10 = vmax.f32 %v1081_v35, 0.0  ;;  %v1100_v30 = vmax.f32 %v1083_v2, 0.0 }
 0x24d   : > { %v919_v9 = vpop.permute.xlu0 %918  ;;  %v924_v52 = vpop.permute.xlu1 %923 }
 0x24e   : > { %v1094_v46 = vpop.f32.mrf.mxu0  ;;  %v1085_v31 = vadd.f32 %v1084_v61, %v919_v9  ;;  %v1087_v26 = vadd.f32 %v1086_v62, %v919_v9  ;;  %v1091_v4 = vadd.f32 %v1090_v7, %v924_v52  ;;  %v1093_v6 = vadd.f32 %v1092_v51, %v924_v52 }
 0x250   : > { %v1096_v33 = vpop.f32.mrf.mxu0  ;;  %v1101_v47 = vmax.f32 %v1085_v31, 0.0  ;;  %v1102_v39 = vmax.f32 %v1087_v26, 0.0  ;;  %v1103_v49 = vmax.f32 %v1091_v4, 0.0  ;;  %v1104_v5 = vmax.f32 %v1093_v6, 0.0 }
 0x251   : > { %v929_v34 = vpop.permute.xlu0 %928  ;;  %v1825_v15 = vpop.permute.xlu1 %1824 }
 0x252   : > { %v1095_v29 = vadd.f32 %v1094_v46, %v929_v34  ;;  %v1097_v48 = vadd.f32 %v1096_v33, %v929_v34 }
 0x254   : > { %v1105_v41 = vmax.f32 %v1095_v29, 0.0  ;;  %v1106_v63 = vmax.f32 %v1097_v48, 0.0 }
 0x255   : > { %v1830_v22 = vpop.permute.xlu0 %1829 }
 0x30a   : > { %v1968_v24 = vpop.f32.mrf.mxu0 }
 0x30b   : > { %v1969_v32 = vadd.f32 %v1968_v24, %v1825_v15 }
 0x30c   : > { %v1970_v28 = vpop.f32.mrf.mxu0 }
 0x30d   : > { %v1971_v23 = vadd.f32 %v1970_v28, %v1825_v15  ;;  %v1977_v27 = vmul.f32 %v1969_v32, %v1099_v10 }
 0x30e   : > { %v1972_v38 = vpop.f32.mrf.mxu0 }
 0x30f   : > { %v1973_v25 = vadd.f32 %v1972_v38, %v1830_v22  ;;  %v1978_v1 = vmul.f32 %v1971_v23, %v1100_v30  ;;  %v4378_v0 = vadd.f32 %v1977_v27, %v1103_v49 }
 0x310   : > { %v1974_v40 = vpop.f32.mrf.mxu0 }
 0x311   : > { %v1979_v50 = vmul.f32 %v1973_v25, %v1101_v47  ;;  %v1975_v3 = vadd.f32 %v1974_v40, %v1830_v22  ;;  %v4382_v42 = vadd.f32 %v1978_v1, %v1104_v5 }
 0x313   : > { %v4380_v45 = vadd.f32 %v1979_v50, %v1105_v41  ;;  %v1980_v13 = vmul.f32 %v1975_v3, %v1102_v39 }
 0x315   : > { %v4384_v53 = vadd.f32 %v1980_v13, %v1106_v63  ;;  %v3445_v43 = vpack.i.bf16 %v4380_v45, %v4378_v0  ;;  %v3413_v11 = vpack.c.bf16 %v4380_v45, %v4378_v0 }
 0x317   : > { %3446 = vrot.lane.b32.xlu1 %v3445_v43, %s3548_s25  ;;  %v3460_v12 = vpack.i.bf16 %v4384_v53, %v4382_v42  ;;  %v3414_v19 = vpack.c.bf16 %v4384_v53, %v4382_v42 }
 0x319   : > { %3461 = vrot.lane.b32.xlu0 %v3460_v12, %s3548_s25 }
 0x31b   : > { %3451 = vrot.lane.b32.xlu1 %v3445_v43, %s3549_s26 }
 0x31d   : > { %3466 = vrot.lane.b32.xlu0 %v3460_v12, %s3549_s26  ;;  %s4794_s26 = smov 111  }
 0x31f   : > { %3456 = vrot.lane.b32.xlu1 %v3445_v43, %s4791_s29 }
 0x321   : > { %3471 = vrot.lane.b32.xlu0 %v3460_v12, %s4791_s29 }
 0x323   : > { %3476 = vrot.lane.b32.xlu1 %v3445_v43, %s4792_s19 }
 0x325   : > { %3501 = vrot.lane.b32.xlu0 %v3460_v12, %s4792_s19 }
 0x327   : > { %3481 = vrot.lane.b32.xlu1 %v3445_v43, %s4793_s30 }
 0x329   : > { %3506 = vrot.lane.b32.xlu0 %v3460_v12, %s4793_s30 }
 0x32b   : > { %3486 = vrot.lane.b32.xlu1 %v3445_v43, %s4789_s14 }
 0x32d   : > { %3511 = vrot.lane.b32.xlu0 %v3460_v12, %s4789_s14 }
 0x32f   : > { %3491 = vrot.lane.b32.xlu1 %v3445_v43, %s4790_s22 }
 0x331   : > { %3516 = vrot.lane.b32.xlu0 %v3460_v12, %s4790_s22 }
 0x333   : > { %3496 = vrot.lane.b32.xlu1 %v3445_v43, %s4794_s26 }
 0x335   : > { %3521 = vrot.lane.b32.xlu0 %v3460_v12, %s4794_s26 }
 0x337   : > { %2231 = vperm.xlu1 %3444, %v2227_v54  }
 0x339   : > { %2236 = vperm.xlu0 %3443, %v2228_v36  }
 0x389   : > { %v3447_v37 = vpop.permute.xlu1 %3446 }
 0x38a   : > { %v3449_v57 = vunpack.i.h.bf16 %v3447_v37  ;;  %v3448_v44 = vunpack.i.l.bf16 %v3447_v37 }
 0x38b   : > { %v3462_v56 = vpop.permute.xlu0 %3461 }
 0x38c   : > { %v3464_v58 = vunpack.i.h.bf16 %v3462_v56  ;;  %v3463_v18 = vunpack.i.l.bf16 %v3462_v56 }
 0x38d   : > { %v3452_v59 = vpop.permute.xlu1 %3451 }
 0x38e   : > { %v2163_v55 = vsel %vm809_vm1, %v3448_v44, %v3463_v18  ;;  %v2164_v60 = vsel %vm809_vm1, %v3449_v57, %v3464_v58  ;;  %v3454_v62 = vunpack.i.h.bf16 %v3452_v59  ;;  %v2165_v8 = vsel %vm809_vm1, %v3463_v18, %v3448_v44 }
 0x38f   : > { %v3419_v61 = vpack.c.bf16 %v2164_v60, %v2163_v55  ;;  %v3467_v7 = vpop.permute.xlu0 %3466  ;;  %v2166_v51 = vsel %vm809_vm1, %v3464_v58, %v3449_v57  ;;  %v3453_v9 = vunpack.i.l.bf16 %v3452_v59 }
 0x390   : > { %v3469_v52 = vunpack.i.h.bf16 %v3467_v7  ;;  %v3468_v46 = vunpack.i.l.bf16 %v3467_v7  ;;  %v3420_v33 = vpack.c.bf16 %v2166_v51, %v2165_v8 }
 0x391   : > { %v3457_v34 = vpop.permute.xlu1 %3456 }
 0x392   : > { %v2137_v35 = vsel %vm767_vm2, %v3453_v9, %v3468_v46  ;;  %v2138_v2 = vsel %vm767_vm2, %v3454_v62, %v3469_v52  ;;  %2341 = vmatprep.subr.bf16.mxu1 %v3420_v33  ;;  %v3459_v24 = vunpack.i.h.bf16 %v3457_v34  ;;  %v2139_v32 = vsel %vm767_vm2, %v3468_v46, %v3453_v9 }
 0x393   : > { %v3417_v15 = vpack.c.bf16 %v2138_v2, %v2137_v35  ;;  %2342 = vmatpush1.bf16.msra.mxu1 %v3419_v61  ;;  %v3472_v31 = vpop.permute.xlu0 %3471  ;;  %v2140_v26 = vsel %vm767_vm2, %v3469_v52, %v3454_v62  ;;  %v3458_v4 = vunpack.i.l.bf16 %v3457_v34 }
 0x394   : > { %v3474_v28 = vunpack.i.h.bf16 %v3472_v31  ;;  %v3473_v10 = vunpack.i.l.bf16 %v3472_v31  ;;  %v3418_v29 = vpack.c.bf16 %v2140_v26, %v2139_v32 }
 0x395   : > { %v3477_v23 = vpop.permute.xlu1 %3476 }
 0x396   : > { %v2111_v30 = vsel %vm725_vm3, %v3458_v4, %v3473_v10  ;;  %v2112_v6 = vsel %vm725_vm3, %v3459_v24, %v3474_v28  ;;  %2343 = vmatprep.subr.bf16.mxu1 %v3418_v29  ;;  %v2113_v47 = vsel %vm725_vm3, %v3473_v10, %v3458_v4  ;;  %v2114_v48 = vsel %vm725_vm3, %v3474_v28, %v3459_v24 }
 0x397   : > { %v3415_v22 = vpack.c.bf16 %v2112_v6, %v2111_v30  ;;  %2344 = vmatpush1.bf16.msra.mxu1 %v3417_v15  ;;  %v3502_v38 = vpop.permute.xlu0 %3501  ;;  %v3416_v39 = vpack.c.bf16 %v2114_v48, %v2113_v47  ;;  %v3479_v49 = vunpack.i.h.bf16 %v3477_v23  ;;  %v3478_v40 = vunpack.i.l.bf16 %v3477_v23  ;;  %v3539_v48 = vld [vmem:[%s4770_s9] ss:$8 sps:$4 sm:$0xff]  }
 0x398   : > { %v3504_v27 = vunpack.i.h.bf16 %v3502_v38  ;;  %v3503_v25 = vunpack.i.l.bf16 %v3502_v38 }
 0x399   : > { %v3482_v41 = vpop.permute.xlu1 %3481  ;;  %2345 = vmatprep.subr.bf16.mxu1 %v3416_v39 }
 0x39a   : > { %v2071_v50 = vsel %vm669_vm4, %v3478_v40, %v3503_v25  ;;  %v2072_v3 = vsel %vm669_vm4, %v3479_v49, %v3504_v27  ;;  %v3484_v13 = vunpack.i.h.bf16 %v3482_v41  ;;  %v3483_v43 = vunpack.i.l.bf16 %v3482_v41 }
 0x39b   : > { %2346 = vmatpush1.bf16.msra.mxu1 %v3415_v22  ;;  %v3507_v1 = vpop.permute.xlu0 %3506  ;;  %v2073_v14 = vsel %vm669_vm4, %v3503_v25, %v3478_v40  ;;  %v2074_v54 = vsel %vm669_vm4, %v3504_v27, %v3479_v49  ;;  %v3412_v36 = vpack.c.bf16 %v2072_v3, %v2071_v50 }
 0x39c   : > { %v3509_v5 = vunpack.i.h.bf16 %v3507_v1  ;;  %v3508_v63 = vunpack.i.l.bf16 %v3507_v1  ;;  %2347 = vmatprep.subr.bf16.mxu1 %v3414_v19  ;;  %v3411_v57 = vpack.c.bf16 %v2074_v54, %v2073_v14  ;;  %v3557_v14 = vmov 1966171168  }
 0x39d   : > { %v3487_v12 = vpop.permute.xlu1 %3486  ;;  %v2464_v54 = vunpack.c.l.s4 %v3557_v14 }
 0x39e   : > { %v2045_v56 = vsel %vm627_vm5, %v3483_v43, %v3508_v63  ;;  %v2046_v42 = vsel %vm627_vm5, %v3484_v13, %v3509_v5  ;;  %v3489_v44 = vunpack.i.h.bf16 %v3487_v12  ;;  %v3488_v58 = vunpack.i.l.bf16 %v3487_v12 }
 0x39f   : > { %2348 = vmatpush1.bf16.msra.mxu1 %v3413_v11  ;;  %v3512_v37 = vpop.permute.xlu0 %3511  ;;  %v2047_v59 = vsel %vm627_vm5, %v3508_v63, %v3483_v43  ;;  %v2048_v0 = vsel %vm627_vm5, %v3509_v5, %v3484_v13  ;;  %v3410_v45 = vpack.c.bf16 %v2046_v42, %v2045_v56  ;;  %v2465_v42 = vunpack.c.0.s8 %v2464_v54 }
 0x3a0   : > { %v3514_v53 = vunpack.i.h.bf16 %v3512_v37  ;;  %v3513_v19 = vunpack.i.l.bf16 %v3512_v37  ;;  %2349 = vmatprep.subr.bf16.mxu1 %v3412_v36  ;;  %v3409_v7 = vpack.c.bf16 %v2048_v0, %v2047_v59 }
 0x3a1   : > { %v3492_v18 = vpop.permute.xlu1 %3491 }
 0x3a2   : > { %v2019_v55 = vsel %vm585_vm6, %v3488_v58, %v3513_v19  ;;  %v2020_v60 = vsel %vm585_vm6, %v3489_v44, %v3514_v53  ;;  %v3494_v8 = vunpack.i.h.bf16 %v3492_v18  ;;  %v3493_v51 = vunpack.i.l.bf16 %v3492_v18 }
 0x3a3   : > { %2350 = vmatpush1.bf16.msra.mxu1 %v3411_v57  ;;  %v3517_v11 = vpop.permute.xlu0 %3516  ;;  %v2021_v9 = vsel %vm585_vm6, %v3513_v19, %v3488_v58  ;;  %v2022_v52 = vsel %vm585_vm6, %v3514_v53, %v3489_v44  ;;  %v3408_v33 = vpack.c.bf16 %v2020_v60, %v2019_v55 }
 0x3a4   : > { %v3519_v61 = vunpack.i.h.bf16 %v3517_v11  ;;  %v3518_v62 = vunpack.i.l.bf16 %v3517_v11  ;;  %2351 = vmatprep.subr.bf16.mxu1 %v3410_v45  ;;  %v3407_v31 = vpack.c.bf16 %v2022_v52, %v2021_v9 }
 0x3a5   : > { %v3497_v46 = vpop.permute.xlu1 %3496 }
 0x3a6   : > { %v1993_v35 = vsel %vm543_vm7, %v3493_v51, %v3518_v62  ;;  %v1994_v2 = vsel %vm543_vm7, %v3494_v8, %v3519_v61  ;;  %v3499_v32 = vunpack.i.h.bf16 %v3497_v46  ;;  %v3498_v26 = vunpack.i.l.bf16 %v3497_v46  ;;  %v3251_v46 = vld [vmem:[%s4772_s11 + $0x40] sm:$0xff] }
 0x3a7   : > { %2352 = vmatpush1.bf16.msra.mxu1 %v3409_v7  ;;  %v3522_v34 = vpop.permute.xlu0 %3521  ;;  %v1995_v4 = vsel %vm543_vm7, %v3518_v62, %v3493_v51  ;;  %v1996_v28 = vsel %vm543_vm7, %v3519_v61, %v3494_v8  ;;  %v3406_v10 = vpack.c.bf16 %v1994_v2, %v1993_v35  ;;  %v2437_v62 = vld [vmem:[%s4772_s11 + $0x8] sm:$0xff]  ;;  %v2436_v7 = vld [vmem:[%s4772_s11] sm:$0xff]  ;;  %v4534_v8 = vsub.s32 %v2465_v42, %v3796_v16 }
 0x3a8   : > { %v3524_v15 = vunpack.i.h.bf16 %v3522_v34  ;;  %v3523_v24 = vunpack.i.l.bf16 %v3522_v34  ;;  %2353 = vmatprep.subr.bf16.mxu1 %v3408_v33  ;;  %v3405_v30 = vpack.c.bf16 %v1996_v28, %v1995_v4  ;;  %v3252_v33 = vld [vmem:[%s4772_s11 + $0x48] sm:$0xff]  ;;  %v2446_v34 = vunpack.c.l.bf16 %v2437_v62  ;;  %v2438_v4 = vld [vmem:[%s4772_s11 + $0x10] sm:$0xff] }
 0x3a9   : > { %v2447_v35 = vunpack.c.h.bf16 %v2437_v62  ;;  %v2444_v2 = vunpack.c.l.bf16 %v2436_v7  ;;  %v2445_v28 = vunpack.c.h.bf16 %v2436_v7  ;;  %v2449_v42 = vunpack.c.h.bf16 %v2438_v4 }
 0x3aa   : > { %v2191_v29 = vsel %vm851_vm8, %v3523_v24, %v3498_v26  ;;  %v2192_v23 = vsel %vm851_vm8, %v3524_v15, %v3499_v32  ;;  %v2189_v6 = vsel %vm851_vm8, %v3498_v26, %v3523_v24  ;;  %v2190_v22 = vsel %vm851_vm8, %v3499_v32, %v3524_v15  ;;  %v4545_v15 = vld [vmem:[%s4772_s11 + $0x18] sm:$0xff] }
 0x3ab   : > { %2354 = vmatpush1.bf16.msra.mxu1 %v3407_v31  ;;  %v3422_v38 = vpack.c.bf16 %v2192_v23, %v2191_v29  ;;  %v3421_v47 = vpack.c.bf16 %v2190_v22, %v2189_v6  ;;  %v2583_v29 = vunpack.c.h.bf16 %v3251_v46  ;;  %v2584_v23 = vunpack.c.l.bf16 %v3252_v33 }
 0x3ac   : > { %2355 = vmatprep.subr.bf16.mxu1 %v3406_v10  ;;  %v2582_v10 = vunpack.c.l.bf16 %v3251_v46  ;;  %v2585_v22 = vunpack.c.h.bf16 %v3252_v33 }
 0x3af   : > { %2356 = vmatpush1.bf16.msra.mxu1 %v3405_v30 }
 0x3b0   : > { %2371 = vmatprep.subr.bf16.mxu1 %v3422_v38  ;;  %v2450_v38 = vunpack.c.l.bf16 %v4545_v15 }
 0x3b2   : > { %v2232_v27 = vpop.permute.xlu1 %2231 }
 0x3b3   : > { %2372 = vmatpush2.bf16.msra.mxu1 %v3421_v47 }
 0x3b4   : > { %v2237_v1 = vpop.permute.xlu0 %2236 }
 0x3b6   : > { %2374 = vmatmul.mubr.bf16.vlgmr.msra.gmra.mxu1 %v3539_v48 }
 0x476   : > { %v2375_v25 = vpop.f32.mrf.mxu1 }
 0x477   : > { %v2376_v39 = vadd.f32 %v2375_v25, %v2232_v27  ;;  %v2448_v25 = vunpack.c.l.bf16 %v2438_v4 }
 0x478   : > { %v2377_v49 = vpop.f32.mrf.mxu1 }
 0x479   : > { %v2378_v40 = vadd.f32 %v2377_v49, %v2232_v27  ;;  %2384 = vrot.lane.b32.xlu1 %v2376_v39, %s4791_s29  ;;  %v2451_v27 = vunpack.c.h.bf16 %v4545_v15  ;;  %v2441_v15 = vld [vmem:[%s4772_s11 + $0x28] sm:$0xff] }
 0x47a   : > { %v2379_v41 = vpop.f32.mrf.mxu1 }
 0x47b   : > { %2388 = vrot.lane.b32.xlu0 %v2378_v40, %s4791_s29  ;;  %v4498_v3 = vadd.f32 %v2379_v41, %v2237_v1 }
 0x47c   : > { %v2381_v50 = vpop.f32.mrf.mxu1 }
 0x47d   : > { %2400 = vrot.lane.b32.xlu1 %v2376_v39, %s3548_s25  ;;  %v4501_v5 = vadd.f32 %v2381_v50, %v2237_v1 }
 0x47f   : > { %2404 = vrot.lane.b32.xlu0 %v2378_v40, %s3548_s25 }
 0x481   : > { %2412 = vrot.lane.b32.xlu1 %v2376_v39, %s4794_s26 }
 0x483   : > { %2416 = vrot.lane.b32.xlu0 %v2378_v40, %s4794_s26 }
 0x485   : > { %2386 = vrot.lane.b32.xlu1 %v4498_v3, %s4791_s29 }
 0x487   : > { %2390 = vrot.lane.b32.xlu0 %v4501_v5, %s4791_s29 }
 0x489   : > { %2402 = vrot.lane.b32.xlu1 %v4498_v3, %s3548_s25 }
 0x48b   : > { %2406 = vrot.lane.b32.xlu0 %v4501_v5, %s3548_s25 }
 0x48d   : > { %2414 = vrot.lane.b32.xlu1 %v4498_v3, %s4794_s26 }
 0x48f   : > { %2418 = vrot.lane.b32.xlu0 %v4501_v5, %s4794_s26  ;;  %s512_s26 = scalar_lea.vmem %s4776_s15, %s4796_s21 }
 0x4eb   : > { %v2385_v63 = vpop.permute.xlu1 %2384 }
 0x4ed   : > { %v2389_v13 = vpop.permute.xlu0 %2388 }
 0x4ee   : > { %v2392_v37 = vsel %vm725_vm3, %v2385_v63, %v2389_v13  ;;  %v2394_v56 = vsel %vm725_vm3, %v2389_v13, %v2385_v63 }
 0x4ef   : > { %v2401_v43 = vpop.permute.xlu1 %2400  ;;  %v2396_v18 = vmax.f32 %v2376_v39, %v2392_v37  ;;  %v2397_v59 = vmax.f32 %v2378_v40, %v2394_v56 }
 0x4f1   : > { %v2405_v12 = vpop.permute.xlu0 %2404 }
 0x4f2   : > { %v2408_v19 = vsel %vm809_vm1, %v2401_v43, %v2405_v12  ;;  %v2410_v57 = vsel %vm809_vm1, %v2405_v12, %v2401_v43 }
 0x4f3   : > { %v2413_v36 = vpop.permute.xlu1 %2412 }
 0x4f5   : > { %v2417_v53 = vpop.permute.xlu0 %2416 }
 0x4f6   : > { %v2420_v44 = vsel %vm851_vm8, %v2413_v36, %v2417_v53  ;;  %v2422_v58 = vsel %vm851_vm8, %v2417_v53, %v2413_v36 }
 0x4f7   : > { %v2424_v0 = vmax.f32 %v2408_v19, %v2420_v44  ;;  %v2425_v45 = vmax.f32 %v2410_v57, %v2422_v58  ;;  %v2387_v11 = vpop.permute.xlu1 %2386 }
 0x4f9   : > { %v2428_v55 = vmax.f32 %v2396_v18, %v2424_v0  ;;  %v2429_v60 = vmax.f32 %v2397_v59, %v2425_v45  ;;  %v2391_v61 = vpop.permute.xlu0 %2390  ;;  %v3253_v0 = vld [vmem:[%s4772_s11 + $0x50] sm:$0xff] }
 0x4fa   : > { %v2393_v31 = vsel %vm725_vm3, %v2387_v11, %v2391_v61  ;;  %v2395_v32 = vsel %vm725_vm3, %v2391_v61, %v2387_v11  ;;  %v2586_v46 = vunpack.c.l.bf16 %v3253_v0 }
 0x4fb   : > { %v2432_v51 = vmax.f32 %v2428_v55, 0.0  ;;  %v2433_v9 = vmax.f32 %v2429_v60, 0.0  ;;  %v2403_v52 = vpop.permute.xlu1 %2402  ;;  %v2398_v47 = vmax.f32 %v4498_v3, %v2393_v31  ;;  %v2399_v48 = vmax.f32 %v4501_v5, %v2395_v32 }
 0x4fd   : > { %v2462_v16 = vcombine.low %v2432_v51, %v2433_v9  ;;  %v2598_v24 = vcombine.high %v2432_v51, %v2433_v9  ;;  %v2407_v26 = vpop.permute.xlu0 %2406  ;;  %v3254_v9 = vld [vmem:[%s4772_s11 + $0x58] sm:$0xff] }
 0x4fe   : > { %v2409_v41 = vsel %vm809_vm1, %v2403_v52, %v2407_v26  ;;  %v2411_v13 = vsel %vm809_vm1, %v2407_v26, %v2403_v52  ;;  %v2588_v32 = vunpack.c.l.bf16 %v3254_v9  ;;  %v2440_v26 = vld [vmem:[%s4772_s11 + $0x20] sm:$0xff] }
 0x4ff   : > { %v2469_v30 = vrot.slane %v2462_v16, %v4534_v8  ;;  %v2605_v6 = vrot.slane %v2598_v24, %v4534_v8  ;;  %v2415_v1 = vpop.permute.xlu1 %2414 }
 0x501   : > { %v2470_v39 = vcombine.high %v2469_v30, %v2469_v30  ;;  %v2477_v49 = vrot.slane %v2469_v30, %v4534_v8  ;;  %v2613_v40 = vrot.slane %v2605_v6, %v4534_v8  ;;  %v2419_v50 = vpop.permute.xlu0 %2418  ;;  %v2606_v63 = vcombine.high %v2605_v6, %v2605_v6 }
 0x502   : > { %v2421_v3 = vsel %vm851_vm8, %v2415_v1, %v2419_v50  ;;  %v2423_v5 = vsel %vm851_vm8, %v2419_v50, %v2415_v1 }
 0x503   : > { %v2426_v43 = vmax.f32 %v2409_v41, %v2421_v3  ;;  %v2427_v12 = vmax.f32 %v2411_v13, %v2423_v5  ;;  %v2490_v14 = vrot.slane %v2477_v49, %v3812_v21  ;;  %v2494_v54 = vrot.slane %v2477_v49, %v3809_v20 }
 0x504   : > { %v2626_v36 = vrot.slane %v2613_v40, %v3812_v21  ;;  %v2630_v37 = vrot.slane %v2613_v40, %v3809_v20  ;;  %v4575_v56 = vrot.slane %v2470_v39, %v4534_v8  ;;  %v4582_v59 = vrot.slane %v2606_v63, %v4534_v8 }
 0x505   : > { %v4577_v53 = vmax.f32 %v2398_v47, %v2426_v43  ;;  %v4579_v19 = vmax.f32 %v2399_v48, %v2427_v12  ;;  %v2529_v17 = vmul.f32 %v2490_v14, %v2446_v34  ;;  %v2530_v57 = vmul.f32 %v2494_v54, %v2447_v35  ;;  %v3256_v48 = vld [vmem:[%s4772_s11 + $0x68] sm:$0xff] }
 0x506   : > { %v2527_v44 = vmul.f32 %v2490_v14, %v2444_v2  ;;  %v2528_v58 = vmul.f32 %v2494_v54, %v2445_v28  ;;  %v2663_v18 = vmul.f32 %v2626_v36, %v2582_v10  ;;  %v2664_v60 = vmul.f32 %v2630_v37, %v2583_v29  ;;  %v3260_v54 = vld [vmem:[%s4772_s11 + $0x88] sm:$0xff] }
 0x507   : > { %v2434_v45 = vmax.f32 %v4577_v53, 0.0  ;;  %v2435_v11 = vmax.f32 %v4579_v19, 0.0  ;;  %v2546_v55 = vadd.f32 %v2530_v57, %v2529_v17  ;;  %v2665_v62 = vmul.f32 %v2626_v36, %v2584_v23  ;;  %v3259_v36 = vld [vmem:[%s4772_s11 + $0x80] sm:$0xff] }
 0x508   : > { %v2543_v61 = vadd.f32 %v2528_v58, %v2527_v44  ;;  %v2666_v7 = vmul.f32 %v2630_v37, %v2585_v22  ;;  %v2498_v51 = vrot.slane %v4575_v56, %v3812_v21  ;;  %v2502_v52 = vrot.slane %v4575_v56, %v3809_v20 }
 0x509   : > { %2547 = vadd.xlane.f32.xlu0 %v2546_v55  ;;  %v2738_v33 = vcombine.low %v2434_v45, %v2435_v11  ;;  %v2634_v34 = vrot.slane %v4582_v59, %v3812_v21  ;;  %v2638_v35 = vrot.slane %v4582_v59, %v3809_v20  ;;  %v2587_v2 = vunpack.c.h.bf16 %v3253_v0 }
 0x50a   : > { %2544 = vadd.xlane.f32.xlu1 %v2543_v61  ;;  %v2679_v16 = vadd.f32 %v2664_v60, %v2663_v18  ;;  %v2531_v24 = vmul.f32 %v2498_v51, %v2448_v25  ;;  %v2532_v31 = vmul.f32 %v2502_v52, %v2449_v42  ;;  %v2682_v4 = vadd.f32 %v2666_v7, %v2665_v62 }
 0x50b   : > { %v2533_v28 = vmul.f32 %v2498_v51, %v2450_v38  ;;  %v2534_v10 = vmul.f32 %v2502_v52, %v2451_v27  ;;  %v2589_v29 = vunpack.c.h.bf16 %v3254_v9  ;;  %v2454_v23 = vunpack.c.l.bf16 %v2441_v15  ;;  %v3255_v38 = vld [vmem:[%s4772_s11 + $0x60] sm:$0xff]  ;;  %v2443_v9 = vld [vmem:[%s4772_s11 + $0x38] sm:$0xff]  ;;  %v2442_v52 = vld [vmem:[%s4772_s11 + $0x30] sm:$0xff] }
 0x50c   : > { %v4611_v30 = vrot.slane %v2738_v33, %v4534_v8  ;;  %v2667_v6 = vmul.f32 %v2634_v34, %v2586_v46  ;;  %v2668_v22 = vmul.f32 %v2638_v35, %v2587_v2  ;;  %v2452_v47 = vunpack.c.l.bf16 %v2440_v26 }
 0x50d   : > { %2680 = vadd.xlane.f32.xlu0 %v2679_v16  ;;  %v2549_v25 = vadd.f32 %v2532_v31, %v2531_v24  ;;  %v2485_v39 = vcombine.high %v2477_v49, %v2477_v49  ;;  %v2453_v41 = vunpack.c.h.bf16 %v2440_v26  ;;  %v2621_v1 = vcombine.high %v2613_v40, %v2613_v40  ;;  %v3258_v26 = vld [vmem:[%s4772_s11 + $0x78] sm:$0xff] }
 0x50e   : > { %2683 = vadd.xlane.f32.xlu1 %v2682_v4  ;;  %v2552_v27 = vadd.f32 %v2534_v10, %v2533_v28  ;;  %v2669_v50 = vmul.f32 %v2634_v34, %v2588_v32  ;;  %v2670_v63 = vmul.f32 %v2638_v35, %v2589_v29  ;;  %v2455_v13 = vunpack.c.h.bf16 %v2441_v15 }
 0x50f   : > { %v2506_v3 = vrot.slane %v2485_v39, %v3812_v21  ;;  %v2510_v5 = vrot.slane %v2485_v39, %v3809_v20  ;;  %v2592_v43 = vunpack.c.l.bf16 %v3256_v48  ;;  %v4623_v12 = vrot.slane %v4611_v30, %v4534_v8 }
 0x510   : > { %v2685_v49 = vadd.f32 %v2668_v22, %v2667_v6  ;;  %v2590_v40 = vunpack.c.l.bf16 %v3255_v38  ;;  %v2591_v14 = vunpack.c.h.bf16 %v3255_v38  ;;  %v2642_v17 = vrot.slane %v2621_v1, %v3812_v21 }
 0x511   : > { %2550 = vadd.xlane.f32.xlu0 %v2549_v25  ;;  %v2535_v37 = vmul.f32 %v2506_v3, %v2452_v47  ;;  %v2536_v42 = vmul.f32 %v2510_v5, %v2453_v41  ;;  %v2646_v57 = vrot.slane %v2621_v1, %v3809_v20  ;;  %v2688_v44 = vadd.f32 %v2670_v63, %v2669_v50 }
 0x512   : > { %2553 = vadd.xlane.f32.xlu1 %v2552_v27  ;;  %v2537_v58 = vmul.f32 %v2506_v3, %v2454_v23  ;;  %v2538_v18 = vmul.f32 %v2510_v5, %v2455_v13  ;;  %v2593_v0 = vunpack.c.h.bf16 %v3256_v48  ;;  %v2722_v55 = vunpack.c.l.bf16 %v3260_v54 }
 0x513   : > { %v2720_v60 = vunpack.c.l.bf16 %v3259_v36  ;;  %v2876_v61 = vcombine.high %v2434_v45, %v2435_v11  ;;  %v2766_v62 = vrot.slane %v4623_v12, %v3812_v21  ;;  %v2770_v7 = vrot.slane %v4623_v12, %v3809_v20 }
 0x514   : > { %v2721_v51 = vunpack.c.h.bf16 %v3259_v36  ;;  %v2555_v19 = vadd.f32 %v2536_v42, %v2535_v37  ;;  %v2671_v46 = vmul.f32 %v2642_v17, %v2590_v40  ;;  %v2672_v53 = vmul.f32 %v2646_v57, %v2591_v14  ;;  %v3262_v42 = vld [vmem:[%s4772_s11 + $0x98] sm:$0xff] }
 0x515   : > { %2686 = vadd.xlane.f32.xlu0 %v2685_v49  ;;  %v2486_v45 = vcombine.high %v4575_v56, %v4575_v56  ;;  %v2558_v11 = vadd.f32 %v2538_v18, %v2537_v58  ;;  %v2673_v33 = vmul.f32 %v2642_v17, %v2592_v43  ;;  %v2674_v34 = vmul.f32 %v2646_v57, %v2593_v0  ;;  %v3257_v56 = vld [vmem:[%s4772_s11 + $0x70] sm:$0xff] }
 0x516   : > { %2689 = vadd.xlane.f32.xlu1 %v2688_v44  ;;  %v2723_v35 = vunpack.c.h.bf16 %v3260_v54  ;;  %v2458_v2 = vunpack.c.l.bf16 %v2443_v9  ;;  %v2456_v15 = vunpack.c.l.bf16 %v2442_v52  ;;  %v4650_v16 = vrot.slane %v2876_v61, %v4534_v8  ;;  %v3261_v17 = vld [vmem:[%s4772_s11 + $0x90] sm:$0xff] }
 0x517   : > { %v2803_v24 = vmul.f32 %v2766_v62, %v2720_v60  ;;  %v2804_v31 = vmul.f32 %v2770_v7, %v2721_v51  ;;  %v2457_v32 = vunpack.c.h.bf16 %v2442_v52  ;;  %v2691_v4 = vadd.f32 %v2672_v53, %v2671_v46  ;;  %v3264_v46 = vld [vmem:[%s4772_s11 + $0xa8] sm:$0xff] }
 0x518   : > { %v2514_v28 = vrot.slane %v2486_v45, %v3812_v21  ;;  %v2518_v10 = vrot.slane %v2486_v45, %v3809_v20  ;;  %v2622_v29 = vcombine.high %v4582_v59, %v4582_v59  ;;  %v2694_v23 = vadd.f32 %v2674_v34, %v2673_v33  ;;  %v3268_v59 = vld [vmem:[%s4772_s11 + $0xc8] sm:$0xff]  ;;  %v3263_v34 = vld [vmem:[%s4772_s11 + $0xa0] sm:$0xff] }
 0x519   : > { %2556 = vadd.xlane.f32.xlu0 %v2555_v19  ;;  %v2805_v6 = vmul.f32 %v2766_v62, %v2722_v55  ;;  %v2806_v22 = vmul.f32 %v2770_v7, %v2723_v35  ;;  %v2459_v47 = vunpack.c.h.bf16 %v2443_v9  ;;  %v2596_v48 = vunpack.c.l.bf16 %v3258_v26 }
 0x51a   : > { %2559 = vadd.xlane.f32.xlu1 %v2558_v11  ;;  %v2594_v25 = vunpack.c.l.bf16 %v3257_v56  ;;  %v2746_v39 = vcombine.high %v4611_v30, %v4611_v30  ;;  %v4666_v41 = vrot.slane %v4650_v16, %v4534_v8  ;;  %v2819_v1 = vadd.f32 %v2804_v31, %v2803_v24  ;;  %v3267_v30 = vld [vmem:[%s4772_s11 + $0xc0] sm:$0xff] }
 0x51b   : > { %v2595_v38 = vunpack.c.h.bf16 %v3257_v56  ;;  %v2539_v27 = vmul.f32 %v2514_v28, %v2456_v15  ;;  %v2540_v50 = vmul.f32 %v2518_v10, %v2457_v32  ;;  %v2650_v63 = vrot.slane %v2622_v29, %v3812_v21  ;;  %v3270_v56 = vld [vmem:[%s4772_s11 + $0xd8] sm:$0xff] }
 0x51c   : > { %v2654_v13 = vrot.slane %v2622_v29, %v3809_v20  ;;  %v2822_v3 = vadd.f32 %v2806_v22, %v2805_v6  ;;  %v2541_v5 = vmul.f32 %v2514_v28, %v2458_v2  ;;  %v2542_v43 = vmul.f32 %v2518_v10, %v2459_v47 }
 0x51d   : > { %2692 = vadd.xlane.f32.xlu0 %v2691_v4  ;;  %v2597_v49 = vunpack.c.h.bf16 %v3258_v26  ;;  %v2862_v40 = vunpack.c.l.bf16 %v3268_v59  ;;  %v2904_v14 = vrot.slane %v4666_v41, %v3812_v21  ;;  %v2908_v54 = vrot.slane %v4666_v41, %v3809_v20 }
 0x51e   : > { %2695 = vadd.xlane.f32.xlu1 %v2694_v23  ;;  %v2860_v36 = vunpack.c.l.bf16 %v3267_v30  ;;  %v2861_v37 = vunpack.c.h.bf16 %v3267_v30  ;;  %v2561_v57 = vadd.f32 %v2540_v50, %v2539_v27  ;;  %v2675_v44 = vmul.f32 %v2650_v63, %v2594_v25  ;;  %v3269_v23 = vld [vmem:[%s4772_s11 + $0xd0] sm:$0xff]  ;;  %v3271_v30 = vld [vmem:[%s4772_s11 + $0xe0] sm:$0xff] }
 0x51f   : > { %v2676_v58 = vmul.f32 %v2654_v13, %v2595_v38  ;;  %v4687_v18 = vrot.slane %v2746_v39, %v4534_v8  ;;  %v2564_v0 = vadd.f32 %v2542_v43, %v2541_v5  ;;  %v2677_v55 = vmul.f32 %v2650_v63, %v2596_v48 }
 0x520   : > { %v2678_v60 = vmul.f32 %v2654_v13, %v2597_v49  ;;  %v2863_v61 = vunpack.c.h.bf16 %v3268_v59  ;;  %v2726_v62 = vunpack.c.l.bf16 %v3262_v42  ;;  %v2724_v7 = vunpack.c.l.bf16 %v3261_v17  ;;  %v3272_v59 = vld [vmem:[%s4772_s11 + $0xe8] sm:$0xff] }
 0x521   : > { %2820 = vadd.xlane.f32.xlu0 %v2819_v1  ;;  %v2884_v51 = vcombine.high %v4650_v16, %v4650_v16  ;;  %v2941_v9 = vmul.f32 %v2904_v14, %v2860_v36  ;;  %v2942_v52 = vmul.f32 %v2908_v54, %v2861_v37  ;;  %v2725_v19 = vunpack.c.h.bf16 %v3261_v17  ;;  %v3266_v37 = vld [vmem:[%s4772_s11 + $0xb8] sm:$0xff] }
 0x522   : > { %2823 = vadd.xlane.f32.xlu1 %v2822_v3  ;;  %v2697_v53 = vadd.f32 %v2676_v58, %v2675_v44  ;;  %v2774_v45 = vrot.slane %v4687_v18, %v3812_v21  ;;  %v2778_v11 = vrot.slane %v4687_v18, %v3809_v20  ;;  %v2761_v33 = vcombine.high %v4623_v12, %v4623_v12  ;;  %v3265_v58 = vld [vmem:[%s4772_s11 + $0xb0] sm:$0xff] }
 0x523   : > { %v2700_v35 = vadd.f32 %v2678_v60, %v2677_v55  ;;  %v2943_v2 = vmul.f32 %v2904_v14, %v2862_v40  ;;  %v2944_v15 = vmul.f32 %v2908_v54, %v2863_v61  ;;  %v2727_v16 = vunpack.c.h.bf16 %v3262_v42 }
 0x524   : > { %v2730_v24 = vunpack.c.l.bf16 %v3264_v46  ;;  %v2957_v31 = vadd.f32 %v2942_v52, %v2941_v9  ;;  %v2728_v32 = vunpack.c.l.bf16 %v3263_v34  ;;  %v2729_v26 = vunpack.c.h.bf16 %v3263_v34 }
 0x525   : > { %2562 = vadd.xlane.f32.xlu0 %v2561_v57  ;;  %v2898_v12 = vrot.slane %v2884_v51, %v4534_v8  ;;  %v2807_v4 = vmul.f32 %v2774_v45, %v2724_v7  ;;  %v2808_v28 = vmul.f32 %v2778_v11, %v2725_v19  ;;  %v2782_v10 = vrot.slane %v2761_v33, %v3812_v21 }
 0x526   : > { %2565 = vadd.xlane.f32.xlu1 %v2564_v0  ;;  %v2786_v29 = vrot.slane %v2761_v33, %v3809_v20  ;;  %v2960_v6 = vadd.f32 %v2944_v15, %v2943_v2  ;;  %v2809_v22 = vmul.f32 %v2774_v45, %v2726_v62  ;;  %v2810_v47 = vmul.f32 %v2778_v11, %v2727_v16  ;;  %v3273_v11 = vld [vmem:[%s4772_s11 + $0xf0] sm:$0xff] }
 0x527   : > { %v2731_v48 = vunpack.c.h.bf16 %v3264_v46  ;;  %v2866_v25 = vunpack.c.l.bf16 %v3270_v56  ;;  %v2912_v39 = vrot.slane %v2898_v12, %v3812_v21  ;;  %v2916_v8 = vrot.slane %v2898_v12, %v3809_v20 }
 0x528   : > { %v2864_v1 = vunpack.c.l.bf16 %v3269_v23  ;;  %v2865_v38 = vunpack.c.h.bf16 %v3269_v23  ;;  %v2825_v27 = vadd.f32 %v2808_v28, %v2807_v4  ;;  %v2811_v50 = vmul.f32 %v2782_v10, %v2728_v32 }
 0x529   : > { %2698 = vadd.xlane.f32.xlu0 %v2697_v53  ;;  %v2812_v63 = vmul.f32 %v2786_v29, %v2729_v26  ;;  %v2899_v13 = vcombine.high %v4666_v41, %v4666_v41  ;;  %v2828_v3 = vadd.f32 %v2810_v47, %v2809_v22  ;;  %v2813_v5 = vmul.f32 %v2782_v10, %v2730_v24  ;;  %v3274_v53 = vld [vmem:[%s4772_s11 + $0xf8] sm:$0xff] }
 0x52a   : > { %2701 = vadd.xlane.f32.xlu1 %v2700_v35  ;;  %v2814_v43 = vmul.f32 %v2786_v29, %v2731_v48  ;;  %v2867_v49 = vunpack.c.h.bf16 %v3270_v56  ;;  %v2870_v40 = vunpack.c.l.bf16 %v3272_v59  ;;  %v2945_v14 = vmul.f32 %v2912_v39, %v2864_v1 }
 0x52b   : > { %v2946_v54 = vmul.f32 %v2916_v8, %v2865_v38  ;;  %v2868_v36 = vunpack.c.l.bf16 %v3271_v30  ;;  %v2762_v41 = vcombine.high %v4687_v18, %v4687_v18  ;;  %v2831_v42 = vadd.f32 %v2812_v63, %v2811_v50 }
 0x52c   : > { %v2920_v17 = vrot.slane %v2899_v13, %v3812_v21  ;;  %v2924_v57 = vrot.slane %v2899_v13, %v3809_v20  ;;  %v2869_v44 = vunpack.c.h.bf16 %v3271_v30  ;;  %v2834_v0 = vadd.f32 %v2814_v43, %v2813_v5 }
 0x52d   : > { %2958 = vadd.xlane.f32.xlu0 %v2957_v31  ;;  %v2947_v55 = vmul.f32 %v2912_v39, %v2866_v25  ;;  %v2948_v60 = vmul.f32 %v2916_v8, %v2867_v49  ;;  %v2871_v61 = vunpack.c.h.bf16 %v3272_v59  ;;  %v2734_v62 = vunpack.c.l.bf16 %v3266_v37 }
 0x52e   : > { %2961 = vadd.xlane.f32.xlu1 %v2960_v6  ;;  %v2963_v7 = vadd.f32 %v2946_v54, %v2945_v14  ;;  %v2790_v18 = vrot.slane %v2762_v41, %v3812_v21  ;;  %v2732_v51 = vunpack.c.l.bf16 %v3265_v58  ;;  %v2733_v9 = vunpack.c.h.bf16 %v3265_v58 }
 0x52f   : > { %v2949_v52 = vmul.f32 %v2920_v17, %v2868_v36  ;;  %v2950_v19 = vmul.f32 %v2924_v57, %v2869_v44  ;;  %v2794_v46 = vrot.slane %v2762_v41, %v3809_v20  ;;  %v2900_v45 = vcombine.high %v2898_v12, %v2898_v12 }
 0x530   : > { %v2966_v33 = vadd.f32 %v2948_v60, %v2947_v55  ;;  %v2951_v34 = vmul.f32 %v2920_v17, %v2870_v40  ;;  %v2952_v35 = vmul.f32 %v2924_v57, %v2871_v61  ;;  %v2735_v2 = vunpack.c.h.bf16 %v3266_v37 }
 0x531   : > { %2826 = vadd.xlane.f32.xlu0 %v2825_v27  ;;  %v2815_v15 = vmul.f32 %v2790_v18, %v2732_v51  ;;  %v2874_v16 = vunpack.c.l.bf16 %v3274_v53  ;;  %v2872_v24 = vunpack.c.l.bf16 %v3273_v11  ;;  %v2873_v31 = vunpack.c.h.bf16 %v3273_v11 }
 0x532   : > { %2829 = vadd.xlane.f32.xlu1 %v2828_v3  ;;  %v2969_v32 = vadd.f32 %v2950_v19, %v2949_v52  ;;  %v2816_v26 = vmul.f32 %v2794_v46, %v2733_v9  ;;  %v2928_v56 = vrot.slane %v2900_v45, %v3812_v21  ;;  %v2932_v12 = vrot.slane %v2900_v45, %v3809_v20 }
 0x533   : > { %v2972_v4 = vadd.f32 %v2952_v35, %v2951_v34  ;;  %v2817_v28 = vmul.f32 %v2790_v18, %v2734_v62  ;;  %v2818_v10 = vmul.f32 %v2794_v46, %v2735_v2  ;;  %v2875_v29 = vunpack.c.h.bf16 %v3274_v53 }
 0x534   : > { %v2837_v23 = vadd.f32 %v2816_v26, %v2815_v15  ;;  %v2953_v6 = vmul.f32 %v2928_v56, %v2872_v24  ;;  %v2954_v22 = vmul.f32 %v2932_v12, %v2873_v31  ;;  %v2955_v48 = vmul.f32 %v2928_v56, %v2874_v16 }
 0x535   : > { %2832 = vadd.xlane.f32.xlu0 %v2831_v42  ;;  %v2840_v47 = vadd.f32 %v2818_v10, %v2817_v28  ;;  %v2956_v25 = vmul.f32 %v2932_v12, %v2875_v29 }
 0x536   : > { %2835 = vadd.xlane.f32.xlu1 %v2834_v0  ;;  %v2975_v39 = vadd.f32 %v2954_v22, %v2953_v6 }
 0x537   : > { %v2978_v8 = vadd.f32 %v2956_v25, %v2955_v48 }
 0x539   : > { %2964 = vadd.xlane.f32.xlu0 %v2963_v7 }
 0x53a   : > { %2967 = vadd.xlane.f32.xlu1 %v2966_v33 }
 0x53d   : > { %2970 = vadd.xlane.f32.xlu0 %v2969_v32 }
 0x53e   : > { %2973 = vadd.xlane.f32.xlu1 %v2972_v4 }
 0x541   : > { %2838 = vadd.xlane.f32.xlu0 %v2837_v23 }
 0x542   : > { %2841 = vadd.xlane.f32.xlu1 %v2840_v47  ;;  %v2989_v47 = vld [vmem:[%s4773_s12] sm:$0xff] }
 0x545   : > { %2976 = vadd.xlane.f32.xlu0 %v2975_v39  ;;  %v2990_v39 = vld [vmem:[%s4773_s12 + $0x8] sm:$0xff] }
 0x546   : > { %2979 = vadd.xlane.f32.xlu1 %v2978_v8 }
 0x592   : > { %v2548_v21 = vpop.xlane.xlu0 %2547 }
 0x593   : > { %v2545_v20 = vpop.xlane.xlu1 %2544 }
 0x596   : > { %v2681_v1 = vpop.xlane.xlu0 %2680 }
 0x597   : > { %v2684_v38 = vpop.xlane.xlu1 %2683 }
 0x59a   : > { %v2551_v59 = vpop.xlane.xlu0 %2550 }
 0x59b   : > { %v2554_v27 = vpop.xlane.xlu1 %2553  ;;  %v2567_v62 = vadd.f32 %v2551_v59, %v2545_v20  ;;  %v2996_v59 = vld [vmem:[%s4774_s13 + $0x8] sm:$0xff] }
 0x59c   : > { %v2570_v9 = vadd.f32 %v2554_v27, %v2548_v21 }
 0x59e   : > { %v2687_v50 = vpop.xlane.xlu0 %2686 }
 0x59f   : > { %v2690_v63 = vpop.xlane.xlu1 %2689  ;;  %v2703_v55 = vadd.f32 %v2687_v50, %v2681_v1  ;;  %v2995_v1 = vld [vmem:[%s4774_s13] sm:$0xff] }
 0x5a0   : > { %v2706_v60 = vadd.f32 %v2690_v63, %v2684_v38 }
 0x5a2   : > { %v2557_v13 = vpop.xlane.xlu0 %2556 }
 0x5a3   : > { %v2560_v30 = vpop.xlane.xlu1 %2559  ;;  %v2568_v46 = vadd.f32 %v2567_v62, %v2557_v13 }
 0x5a4   : > { %v2571_v11 = vadd.f32 %v2570_v9, %v2560_v30 }
 0x5a6   : > { %v2693_v3 = vpop.xlane.xlu0 %2692 }
 0x5a7   : > { %v2696_v5 = vpop.xlane.xlu1 %2695  ;;  %v2704_v7 = vadd.f32 %v2703_v55, %v2693_v3 }
 0x5a8   : > { %v2707_v52 = vadd.f32 %v2706_v60, %v2696_v5 }
 0x5aa   : > { %v2821_v43 = vpop.xlane.xlu0 %2820 }
 0x5ab   : > { %v2824_v49 = vpop.xlane.xlu1 %2823 }
 0x5ae   : > { %v2563_v40 = vpop.xlane.xlu0 %2562 }
 0x5af   : > { %v2566_v14 = vpop.xlane.xlu1 %2565  ;;  %v2569_v2 = vadd.f32 %v2568_v46, %v2563_v40 }
 0x5b0   : > { %v2572_v31 = vadd.f32 %v2571_v11, %v2566_v14 }
 0x5b2   : > { %v2699_v54 = vpop.xlane.xlu0 %2698 }
 0x5b3   : > { %v2702_v36 = vpop.xlane.xlu1 %2701  ;;  %v2705_v53 = vadd.f32 %v2704_v7, %v2699_v54 }
 0x5b4   : > { %v2708_v33 = vadd.f32 %v2707_v52, %v2702_v36 }
 0x5b5   : > { %v2709_v56 = vadd.f32 %v2705_v53, %v2569_v2 }
 0x5b6   : > { %v2959_v37 = vpop.xlane.xlu0 %2958  ;;  %v2710_v4 = vadd.f32 %v2708_v33, %v2572_v31 }
 0x5b7   : > { %v2962_v41 = vpop.xlane.xlu1 %2961 }
 0x5ba   : > { %v2827_v42 = vpop.xlane.xlu0 %2826 }
 0x5bb   : > { %v2830_v17 = vpop.xlane.xlu1 %2829  ;;  %v2843_v18 = vadd.f32 %v2827_v42, %v2821_v43 }
 0x5bc   : > { %v2846_v19 = vadd.f32 %v2830_v17, %v2824_v49 }
 0x5be   : > { %v2833_v57 = vpop.xlane.xlu0 %2832 }
 0x5bf   : > { %v2836_v44 = vpop.xlane.xlu1 %2835  ;;  %v2844_v45 = vadd.f32 %v2843_v18, %v2833_v57 }
 0x5c0   : > { %v2847_v34 = vadd.f32 %v2846_v19, %v2836_v44 }
 0x5c2   : > { %v2965_v58 = vpop.xlane.xlu0 %2964 }
 0x5c3   : > { %v2968_v0 = vpop.xlane.xlu1 %2967  ;;  %v2981_v15 = vadd.f32 %v2965_v58, %v2959_v37  ;;  %v3012_v37 = vld [vmem:[#allocation3] sm:$0x1] }
 0x5c4   : > { %v2984_v32 = vadd.f32 %v2968_v0, %v2962_v41 }
 0x5c6   : > { %v2971_v61 = vpop.xlane.xlu0 %2970 }
 0x5c7   : > { %v2974_v51 = vpop.xlane.xlu1 %2973  ;;  %v2982_v12 = vadd.f32 %v2981_v15, %v2971_v61 }
 0x5c8   : > { %v2985_v28 = vadd.f32 %v2984_v32, %v2974_v51 }
 0x5ca   : > { %v2839_v35 = vpop.xlane.xlu0 %2838 }
 0x5cb   : > { %v2845_v16 = vadd.f32 %v2844_v45, %v2839_v35  ;;  %v2842_v24 = vpop.xlane.xlu1 %2841 }
 0x5cc   : > { %v2848_v26 = vadd.f32 %v2847_v34, %v2842_v24 }
 0x5cd   : > { %v2849_v29 = vadd.f32 %v2845_v16, %v2709_v56 }
 0x5ce   : > { %v2977_v10 = vpop.xlane.xlu0 %2976  ;;  %v2850_v22 = vadd.f32 %v2848_v26, %v2710_v4 }
 0x5cf   : > { %v2983_v23 = vadd.f32 %v2982_v12, %v2977_v10  ;;  %v2980_v6 = vpop.xlane.xlu1 %2979 }
 0x5d0   : > { %v2986_v48 = vadd.f32 %v2985_v28, %v2980_v6 }
 0x5d1   : > { %v2987_v25 = vadd.f32 %v2983_v23, %v2849_v29 }
 0x5d2   : > { %v2988_v8 = vadd.f32 %v2986_v48, %v2850_v22 }
 0x5d3   : > { %v2991_v21 = vadd.f32 %v2989_v47, %v2987_v25 }
 0x5d4   : > { %v2992_v20 = vadd.f32 %v2990_v39, %v2988_v8 }
 0x5d5   : > { %v2993_v38 = vmax.f32 %v2991_v21, 0.0 }
 0x5d6   : > { %v2994_v27 = vmax.f32 %v2992_v20, 0.0 }
 0x5d7   : > { %v2997_v50 = vmul.f32 %v2995_v1, %v2993_v38 }
 0x5d8   : > { %v2998_v63 = vmul.f32 %v2996_v59, %v2994_v27 }
 0x5d9   : > { %v3000_v13 = vsel %vm2999_vm9, %v2997_v50, 0.0 }
 0x5da   : > { %v3001_v30 = vsel %vm2999_vm9, %v2998_v63, 0.0 }
 0x5db   : > { %v3002_v3 = vadd.f32 %v3001_v30, %v3000_v13 }
 0x5dd   : > { %3003 = vadd.xlane.f32.xlu0 %v3002_v3 }
 0x666   : > { %v3004_v5 = vpop.xlane.xlu0 %3003 }
 0x667   : > { %v3005_v43 = vrot.slane %v3004_v5, 4 }
 0x669   : > { %v3006_v49 = vadd.f32 %v3005_v43, %v3004_v5 }
 0x66b   : > { %v3007_v40 = vrot.slane %v3006_v49, 2 }
 0x66d   : > { %v3008_v14 = vadd.f32 %v3007_v40, %v3006_v49 }
 0x66f   : > { %v3009_v54 = vrot.slane %v3008_v14, 1 }
 0x671   : > { %v3010_v36 = vadd.f32 %v3009_v54, %v3008_v14 }
 0x673   : > { %3423 = vpush %v3010_v36 }
 0x6a4   : > { %s3424_s29 = spop %3423 }
 0x6a5   : > { %v3013_v41 = vstv %s3424_s29 }
 0x6a6   : > { %v3014_v42 = vadd.f32 %v3013_v41, %v3012_v37 }
 0x6a8   : > { %3016 = vst.msk [vmem:[%s512_s26] sm:$0x1] %vm3015_vm10, %v3014_v42 }
 0x6a9 PF: > { %s27_s20 = sadd.s32 1, %s3546_s20  }
 0x6aa   : > { %p24_p4 = scmp.ge.s32.totalorder %s27_s20, 4  }
 0x6ac   :  { %26 = sbr.rel (!%p24_p4) target bundleno = 3 (0x3), region = 123 }

</bundles_post_ra>
